<compile_context>
chip_gen: v7x
topology: tpu7x:2x2x1
jax: 0.10.0
libtpu: 0.0.40
codegen_flags: <defaults>
</compile_context>

<pallas_src>
import jax
import jax.numpy as jnp
from jax.experimental import pallas as pl
from jax.experimental.pallas import tpu as pltpu


def _round_up(x, m):
    return ((x + m - 1) // m) * m


# ----------------------------------------------------------------------------
# Fused kernel: batched conv-GEMM over spatial positions -> ReLU ->
# batched head-GEMM -> sum over positions -> + head bias.
# All operands are pre-laid-out by the wrapper so the kernel only runs
# lane/sublane-friendly batched 2-D matmuls (no in-kernel transpose/reshape).
# ----------------------------------------------------------------------------
def _fused_forward_kernel(cols_ref, w1_ref, w3_ref, b2_ref, out_ref):
    # cols_ref: (P, BT, KP) bf16  im2col patches, position-major, K zero-padded,
    #                             with a ones-column that carries the conv bias.
    # w1_ref:   (P, KP, C)  bf16  conv weight (+bias row), tiled over positions.
    # w3_ref:   (P, C, NP)  bf16  head weight permuted to (position, channel, class).
    # b2_ref:   (1, NP)     f32   head bias (class dim zero-padded to NP=128k).
    # out_ref:  (BT, NP)    f32   logits, lane-dense (NP multiple of 128).
    y = jnp.einsum('pbk,pkc->pbc', cols_ref[...], w1_ref[...],
                   preferred_element_type=jnp.float32)
    y = jnp.maximum(y, 0.0).astype(jnp.bfloat16)        # conv + ReLU, stays in VMEM/vregs
    t = jnp.einsum('pbc,pcn->pbn', y, w3_ref[...],
                   preferred_element_type=jnp.float32)
    logits = jnp.sum(t, axis=0) + b2_ref[...]
    out_ref[...] = logits.astype(out_ref.dtype)


def _fused_forward(cols3, w1, w3, b2):
    """cols3: (P, B, KP) bf16 -> logits_padded (B, NP) f32 via one pallas_call."""
    P, B, KP = cols3.shape
    C = w1.shape[-1]
    NP = w3.shape[-1]

    # Batch tiling: single block for small B; 128-row tiles (parallel grid) for large B.
    BT = B if B <= 128 else 128
    Bp = _round_up(B, BT)
    if Bp != B:
        cols3 = jnp.pad(cols3, ((0, 0), (0, Bp - B), (0, 0)))

    out = pl.pallas_call(
        _fused_forward_kernel,
        out_shape=jax.ShapeDtypeStruct((Bp, NP), jnp.float32),
        grid=(Bp // BT,),
        in_specs=[
            pl.BlockSpec((P, BT, KP), lambda i: (0, i, 0)),   # patches: tile over batch
            pl.BlockSpec((P, KP, C), lambda i: (0, 0, 0)),    # conv weight: resident
            pl.BlockSpec((P, C, NP), lambda i: (0, 0, 0)),    # head weight: resident
            pl.BlockSpec((1, NP), lambda i: (0, 0)),          # head bias
        ],
        out_specs=pl.BlockSpec((BT, NP), lambda i: (i, 0)),
        compiler_params=pltpu.CompilerParams(
            dimension_semantics=("parallel",)),
    )(cols3, w1, w3, b2)
    return out[:B]


# ----------------------------------------------------------------------------
# Wrapper-side patch extraction (pure slicing/reshape on a few KB, fused by XLA
# under jit).  Produces position-major rows so the kernel needs no relayout.
# ----------------------------------------------------------------------------
def _im2col_position_major(x_nchw, kernel, stride, pad, k_pad):
    B, C, H, W = x_nchw.shape
    x = jnp.transpose(x_nchw, (0, 2, 3, 1))                        # NHWC
    xp = jnp.pad(x, ((0, 0), (pad, pad), (pad, pad), (0, 0)))
    OH = (H + 2 * pad - kernel) // stride + 1
    OW = (W + 2 * pad - kernel) // stride + 1
    taps = [xp[:, i:i + stride * OH:stride, j:j + stride * OW:stride, :]
            for i in range(kernel) for j in range(kernel)]
    cols = jnp.concatenate(taps, axis=-1)                          # (B, OH, OW, k*k*C)
    K = kernel * kernel * C
    cols = cols.reshape(B, OH * OW, K)
    cols = jnp.transpose(cols, (1, 0, 2))                          # (P, B, K) position-major
    ones = jnp.ones((OH * OW, B, 1), cols.dtype)                   # carries the conv bias
    zeros = jnp.zeros((OH * OW, B, k_pad - K - 1), cols.dtype)
    cols = jnp.concatenate([cols, ones, zeros], axis=-1)           # (P, B, k_pad)
    return cols.astype(jnp.bfloat16), OH, OW


# ----------------------------------------------------------------------------
# ScalableTransformerNG forward (JAX + Pallas)
# ----------------------------------------------------------------------------
class ScalableTransformerNGPallas:
    def __init__(self, key, in_channels=3, features_planes=32, nclasses=10,
                 kernel=3, stride=2, out_hw=(8, 8)):
        self.in_channels = in_channels
        self.features_planes = features_planes
        self.nclasses = nclasses
        self.kernel = kernel
        self.stride = stride
        self.out_hw = out_hw
        OH, OW = out_hw
        P = OH * OW

        k1, k2, k3, k4 = jax.random.split(key, 4)
        # NE stem conv weight, PyTorch layout (Cout, Cin, KH, KW)
        conv_w = 0.05 * jax.random.normal(
            k1, (features_planes, in_channels, kernel, kernel), jnp.float32)
        conv_b = 0.05 * jax.random.normal(k2, (features_planes,), jnp.float32)
        # NG_pred Linear, PyTorch layout (nclasses, in_features=C*H*W)
        in_features = features_planes * P
        fc_w = 0.02 * jax.random.normal(k3, (nclasses, in_features), jnp.float32)
        fc_b = 0.02 * jax.random.normal(k4, (nclasses,), jnp.float32)

        # ---- one-time weight re-layout (fusion / lane-density / K alignment) ----
        K = kernel * kernel * in_channels
        self.k_pad = _round_up(K + 1, 8)            # +1 ones/bias column
        self.n_pad = _round_up(nclasses, 128)       # lane-dense logits

        # conv weight -> (K, Cout) in im2col (kh, kw, cin) order, bias row appended,
        # zero-padded to k_pad, then tiled over positions for the batched matmul.
        w1 = jnp.transpose(conv_w, (2, 3, 1, 0)).reshape(K, features_planes)
        w1 = jnp.concatenate(
            [w1, conv_b[None, :],
             jnp.zeros((self.k_pad - K - 1, features_planes), jnp.float32)], axis=0)
        self.w1 = jnp.broadcast_to(
            w1[None], (P, self.k_pad, features_planes)).astype(jnp.bfloat16)

        # head weight permuted so it consumes the (position, channel) activation
        # directly: w3[p, c, n] = fc_w[n, c*P + p]  (PyTorch C,H,W flatten order).
        w3 = fc_w.reshape(nclasses, features_planes, P)
        w3 = jnp.transpose(w3, (2, 1, 0))
        w3 = jnp.pad(w3, ((0, 0), (0, 0), (0, self.n_pad - nclasses)))
        self.w3 = w3.astype(jnp.bfloat16)

        self.b2 = jnp.pad(fc_b, (0, self.n_pad - nclasses)).reshape(1, self.n_pad)

        # keep original-layout params for reference / porting checks
        self.conv_w, self.conv_b, self.fc_w, self.fc_b = conv_w, conv_b, fc_w, fc_b

        self._forward = jax.jit(self._forward_impl)

    def _forward_impl(self, x_nchw):
        # ---- NE.features: 3x3 stride-2 conv + ReLU (im2col + fused Pallas GEMMs) ----
        cols3, OH, OW = _im2col_position_major(
            x_nchw, self.kernel, self.stride, pad=1, k_pad=self.k_pad)
        assert (OH, OW) == self.out_hw
        # ---- NG.NG_block: growth=[] -> identity ----
        # ---- NG.NG_pred: Flatten + Linear, fused with the conv GEMM in-kernel ----
        logits_padded = _fused_forward(cols3, self.w1, self.w3, self.b2)
        return logits_padded[:, :self.nclasses]

    def __call__(self, x_nchw):
        return self._forward(x_nchw)


if __name__ == "__main__":
    key = jax.random.PRNGKey(0)
    k_param, k_in = jax.random.split(key)

    model = ScalableTransformerNGPallas(
        k_param, in_channels=3, features_planes=32, nclasses=10)

    # small CIFAR-like input: (B, C, H, W) = (2, 3, 16, 16) -> 8x8 after stride-2 stem
    x = jax.random.normal(k_in, (2, 3, 16, 16), jnp.float32)

    logits = model(x)
    jax.block_until_ready(logits)
    assert logits.shape == (2, 10), logits.shape
    print("KERNEL_OK")
</pallas_src>

<mosaic_0001>
module attributes {stable_mosaic.version = 11 : i64} {
  func.func @_fused_forward_kernel(%arg0: i32, %arg1: memref<64x2x32xbf16, #tpu.memory_space<vmem>>, %arg2: memref<64x32x32xbf16, #tpu.memory_space<vmem>>, %arg3: memref<64x32x128xbf16, #tpu.memory_space<vmem>>, %arg4: memref<1x128xf32, #tpu.memory_space<vmem>>, %arg5: memref<2x128xf32, #tpu.memory_space<vmem>>) attributes {dimension_semantics = [#tpu.dimension_semantics<parallel>], iteration_bounds = array<i64: 1>, scalar_prefetch = 0 : i64, scratch_operands = 0 : i64, tpu.core_type = #tpu.core_type<tc>, window_params = [{transform_indices = @transform_0, window_bounds = array<i64: 64, 2, 32>}, {pipeline_mode = #tpu.pipeline_mode<synchronous>, transform_indices = @transform_1, window_bounds = array<i64: 64, 32, 32>}, {pipeline_mode = #tpu.pipeline_mode<synchronous>, transform_indices = @transform_2, window_bounds = array<i64: 64, 32, 128>}, {pipeline_mode = #tpu.pipeline_mode<synchronous>, transform_indices = @transform_3, window_bounds = array<i64: 1, 128>}, {transform_indices = @transform_4, window_bounds = array<i64: 2, 128>}]} {
    %c0 = arith.constant 0 : index
    %c0_0 = arith.constant 0 : index
    %c0_1 = arith.constant 0 : index
    %0 = vector.load %arg1[%c0, %c0_0, %c0_1] : memref<64x2x32xbf16, #tpu.memory_space<vmem>>, vector<64x2x32xbf16>
    %c0_2 = arith.constant 0 : index
    %c0_3 = arith.constant 0 : index
    %c0_4 = arith.constant 0 : index
    %1 = vector.load %arg2[%c0_2, %c0_3, %c0_4] : memref<64x32x32xbf16, #tpu.memory_space<vmem>>, vector<64x32x32xbf16>
    "tpu.trace_start"() <{level = 10 : i32, message = "pbk,pkc->pbc"}> : () -> ()
    %cst = arith.constant dense<0.000000e+00> : vector<64x2x32xf32>
    %2 = tpu.matmul %0, %1, %cst {dimension_numbers = #tpu.dot_dimension_numbers<[2], [1], [1], [2], [0, 0, 0, 1, 1, 2], [0], [0]>} : vector<64x2x32xbf16>, vector<64x32x32xbf16>, vector<64x2x32xf32> -> vector<64x2x32xf32>
    "tpu.trace_stop"() : () -> ()
    %cst_5 = arith.constant 0.000000e+00 : f32
    %3 = vector.broadcast %cst_5 : f32 to vector<64x2x32xf32>
    %4 = arith.maximumf %2, %3 : vector<64x2x32xf32>
    %5 = arith.truncf %4 : vector<64x2x32xf32> to vector<64x2x32xbf16>
    %c0_6 = arith.constant 0 : index
    %c0_7 = arith.constant 0 : index
    %c0_8 = arith.constant 0 : index
    %6 = vector.load %arg3[%c0_6, %c0_7, %c0_8] : memref<64x32x128xbf16, #tpu.memory_space<vmem>>, vector<64x32x128xbf16>
    "tpu.trace_start"() <{level = 10 : i32, message = "pbc,pcn->pbn"}> : () -> ()
    %cst_9 = arith.constant dense<0.000000e+00> : vector<64x2x128xf32>
    %7 = tpu.matmul %5, %6, %cst_9 {dimension_numbers = #tpu.dot_dimension_numbers<[2], [1], [1], [2], [0, 0, 0, 1, 1, 2], [0], [0]>} : vector<64x2x32xbf16>, vector<64x32x128xbf16>, vector<64x2x128xf32> -> vector<64x2x128xf32>
    "tpu.trace_stop"() : () -> ()
    %cst_10 = arith.constant dense<0.000000e+00> : vector<2x128xf32>
    %8 = vector.multi_reduction <add>, %7, %cst_10 [0] : vector<64x2x128xf32> to vector<2x128xf32>
    %c0_11 = arith.constant 0 : index
    %c0_12 = arith.constant 0 : index
    %9 = vector.load %arg4[%c0_11, %c0_12] : memref<1x128xf32, #tpu.memory_space<vmem>>, vector<1x128xf32>
    %10 = vector.broadcast %9 : vector<1x128xf32> to vector<2x128xf32>
    %11 = arith.addf %8, %10 : vector<2x128xf32>
    %c0_13 = arith.constant 0 : index
    %c0_14 = arith.constant 0 : index
    %12 = vector.load %arg5[%c0_13, %c0_14] : memref<2x128xf32, #tpu.memory_space<vmem>>, vector<2x128xf32>
    tpu.vector_store %arg5[%c0_13, %c0_14], %11 {strides = array<i32>} : memref<2x128xf32, #tpu.memory_space<vmem>>, vector<2x128xf32>,
    return
  }
  func.func @transform_0(%arg0: i32) -> (i32, i32, i32) {
    %c0_i32 = arith.constant 0 : i32
    %c0_i32_0 = arith.constant 0 : i32
    %c0_i32_1 = arith.constant 0 : i32
    return %c0_i32, %arg0, %c0_i32_0 : i32, i32, i32
  }
  func.func @transform_1(%arg0: i32) -> (i32, i32, i32) {
    %c0_i32 = arith.constant 0 : i32
    %c0_i32_0 = arith.constant 0 : i32
    %c0_i32_1 = arith.constant 0 : i32
    %c0_i32_2 = arith.constant 0 : i32
    return %c0_i32, %c0_i32_0, %c0_i32_1 : i32, i32, i32
  }
  func.func @transform_2(%arg0: i32) -> (i32, i32, i32) {
    %c0_i32 = arith.constant 0 : i32
    %c0_i32_0 = arith.constant 0 : i32
    %c0_i32_1 = arith.constant 0 : i32
    %c0_i32_2 = arith.constant 0 : i32
    return %c0_i32, %c0_i32_0, %c0_i32_1 : i32, i32, i32
  }
  func.func @transform_3(%arg0: i32) -> (i32, i32) {
    %c0_i32 = arith.constant 0 : i32
    %c0_i32_0 = arith.constant 0 : i32
    %c0_i32_1 = arith.constant 0 : i32
    return %c0_i32, %c0_i32_0 : i32, i32
  }
  func.func @transform_4(%arg0: i32) -> (i32, i32) {
    %c0_i32 = arith.constant 0 : i32
    %c0_i32_0 = arith.constant 0 : i32
    return %arg0, %c0_i32 : i32, i32
  }
}

</mosaic_0001>

<bundles_post_ra>
// kernel: _forward_impl.1
= control target key start
LH: loop header
LB: loop body
LE: loop exit
PB: predicated region body
PF: predicated region fallthrough
CT: control target
= control target key end

     0   :  { %v9991_v1 = vmov 0.0   ;;  %vm9992_vm0 = vmmov 0   ;;  %vm351_vm1 = vcmask 261120   ;;  %s11890_s0 = inlined_call_operand.vmem [shape: bf16[64,2,32], index: 0, kind: input, shape index: {}]   ;;  %s11891_s1 = inlined_call_operand.vmem [shape: bf16[64,32,32], index: 1, kind: input, shape index: {}]   ;;  %s11892_s2 = inlined_call_operand.vmem [shape: bf16[64,32,128], index: 2, kind: input, shape index: {}]   ;;  %s11893_s3 = inlined_call_operand.vmem [shape: f32[1,128], index: 3, kind: input, shape index: {}]   ;;  %s11894_s4 = inlined_call_operand.hbm [shape: f32[2,128], index: 4, kind: output, shape index: {}]  }
   0x1   :  { %v9711_v0 = vld [vmem:[%s11891_s1] sm:$0xff]   ;;  %8684 = vmatprep.subr.bf16.mxu0 %v9991_v1  ;;  %8692 = vmatprep.subr.bf16.mxu1 %v9991_v1  ;;  %v9712_v2 = vld [vmem:[%s11891_s1 + $0x10] sm:$0xff]   ;;  %v9713_v3 = vld [vmem:[%s11891_s1 + $0x8] sm:$0xff]  }
   0x2   :  { %8685 = vmatpush3.bf16.msra.mxu0 %v9711_v0  ;;  %8688 = vmatprep.mubr.msk.bf16.mxu0 %vm9992_vm0, %v9991_v1  ;;  %v9714_v4 = vld [vmem:[%s11891_s1 + $0x18] sm:$0xff]   ;;  %v19_v5 = vld [vmem:[%s11890_s0] sm:$0x1]  ;;  %v20_v6 = vld [vmem:[%s11890_s0 + $0x1] sm:$0x1] }
   0x3   :  { %8693 = vmatpush3.bf16.msra.mxu1 %v9712_v2  ;;  %8686 = vmatprep.subr.bf16.mxu0 %v9991_v1  ;;  %v9715_v7 = vld [vmem:[%s11891_s1 + $0x20] sm:$0xff]   ;;  %v9716_v8 = vld [vmem:[%s11891_s1 + $0x30] sm:$0xff]   ;;  %v9717_v9 = vld [vmem:[%s11891_s1 + $0x28] sm:$0xff]  }
   0x4   :  { %8694 = vmatprep.subr.bf16.mxu1 %v9991_v1  ;;  %8696 = vmatprep.mubr.msk.bf16.mxu1 %vm9992_vm0, %v9991_v1  ;;  %v9718_v10 = vld [vmem:[%s11891_s1 + $0x38] sm:$0xff]   ;;  %v21_v11 = vld [vmem:[%s11890_s0 + $0x2] sm:$0x1]  ;;  %v22_v12 = vld [vmem:[%s11890_s0 + $0x3] sm:$0x1] }
   0x5   :  { %v9719_v13 = vld [vmem:[%s11891_s1 + $0x40] sm:$0xff]   ;;  %v9720_v14 = vld [vmem:[%s11891_s1 + $0x50] sm:$0xff]   ;;  %v9721_v15 = vld [vmem:[%s11891_s1 + $0x48] sm:$0xff]  }
   0x6   :  { %8687 = vmatpush3.bf16.msra.mxu0 %v9713_v3  ;;  %v9722_v16 = vld [vmem:[%s11891_s1 + $0x58] sm:$0xff]   ;;  %v23_v17 = vld [vmem:[%s11890_s0 + $0x4] sm:$0x1]  ;;  %v24_v18 = vld [vmem:[%s11890_s0 + $0x5] sm:$0x1] }
   0x7   :  { %8695 = vmatpush3.bf16.msra.mxu1 %v9714_v4  ;;  %8700 = vmatprep.subr.bf16.mxu0 %v9991_v1  ;;  %v9723_v19 = vld [vmem:[%s11891_s1 + $0x60] sm:$0xff]   ;;  %v9724_v20 = vld [vmem:[%s11891_s1 + $0x70] sm:$0xff]   ;;  %v9725_v21 = vld [vmem:[%s11891_s1 + $0x68] sm:$0xff]  }
   0x8   :  { %8708 = vmatprep.subr.bf16.mxu1 %v9991_v1  ;;  %v9726_v22 = vld [vmem:[%s11891_s1 + $0x78] sm:$0xff]   ;;  %v25_v23 = vld [vmem:[%s11890_s0 + $0x6] sm:$0x1]  ;;  %v26_v24 = vld [vmem:[%s11890_s0 + $0x7] sm:$0x1] }
   0x9   :  { %8689 = vmatmul.mubr.msk.bf16.vlgmr.msra.gmra.mrb[0].mxu0 %vm351_vm1, %v19_v5  ;;  %v9727_v25 = vld [vmem:[%s11891_s1 + $0x80] sm:$0xff]   ;;  %v9728_v26 = vld [vmem:[%s11891_s1 + $0x90] sm:$0xff]   ;;  %v9729_v27 = vld [vmem:[%s11891_s1 + $0x88] sm:$0xff]  }
   0xa   :  { %8697 = vmatmul.mubr.msk.bf16.vlgmr.msra.gmra.mrb[0].mxu1 %vm351_vm1, %v20_v6  ;;  %8701 = vmatpush3.bf16.msra.mxu0 %v9715_v7  ;;  %v9730_v28 = vld [vmem:[%s11891_s1 + $0x98] sm:$0xff]   ;;  %v27_v29 = vld [vmem:[%s11890_s0 + $0x8] sm:$0x1]  ;;  %v28_v30 = vld [vmem:[%s11890_s0 + $0x9] sm:$0x1] }
   0xb   :  { %8709 = vmatpush3.bf16.msra.mxu1 %v9716_v8  ;;  %8702 = vmatprep.subr.bf16.mxu0 %v9991_v1  ;;  %v9731_v31 = vld [vmem:[%s11891_s1 + $0xa0] sm:$0xff]   ;;  %v9732_v32 = vld [vmem:[%s11891_s1 + $0xb0] sm:$0xff]   ;;  %v9733_v33 = vld [vmem:[%s11891_s1 + $0xa8] sm:$0xff]  }
   0xc   :  { %8710 = vmatprep.subr.bf16.mxu1 %v9991_v1  ;;  %8704 = vmatprep.mubr.msk.bf16.mxu0 %vm9992_vm0, %v9991_v1  ;;  %v9734_v34 = vld [vmem:[%s11891_s1 + $0xb8] sm:$0xff]   ;;  %v29_v35 = vld [vmem:[%s11890_s0 + $0xa] sm:$0x1]  ;;  %v30_v36 = vld [vmem:[%s11890_s0 + $0xb] sm:$0x1] }
   0xd   :  { %8712 = vmatprep.mubr.msk.bf16.mxu1 %vm9992_vm0, %v9991_v1  ;;  %v9735_v37 = vld [vmem:[%s11891_s1 + $0xc0] sm:$0xff]   ;;  %v9736_v38 = vld [vmem:[%s11891_s1 + $0xd0] sm:$0xff]   ;;  %v9737_v39 = vld [vmem:[%s11891_s1 + $0xc8] sm:$0xff]  }
   0xe   :  { %8703 = vmatpush3.bf16.msra.mxu0 %v9717_v9  ;;  %v9738_v40 = vld [vmem:[%s11891_s1 + $0xd8] sm:$0xff]   ;;  %v31_v41 = vld [vmem:[%s11890_s0 + $0xc] sm:$0x1]  ;;  %v9739_v42 = vld [vmem:[%s11891_s1 + $0xe0] sm:$0xff]  }
   0xf   :  { %8711 = vmatpush3.bf16.msra.mxu1 %v9718_v10  ;;  %8716 = vmatprep.subr.bf16.mxu0 %v9991_v1  ;;  %v32_v43 = vld [vmem:[%s11890_s0 + $0xd] sm:$0x1]  ;;  %v9740_v44 = vld [vmem:[%s11891_s1 + $0xf0] sm:$0xff]   ;;  %v9742_v46 = vld [vmem:[%s11891_s1 + $0xf8] sm:$0xff]  }
  0x10   :  { %8724 = vmatprep.subr.bf16.mxu1 %v9991_v1  ;;  %v9741_v45 = vld [vmem:[%s11891_s1 + $0xe8] sm:$0xff]   ;;  %v9743_v49 = vld [vmem:[%s11891_s1 + $0x100] sm:$0xff]   ;;  %v9744_v50 = vld [vmem:[%s11891_s1 + $0x110] sm:$0xff]  }
  0x11   :  { %8705 = vmatmul.mubr.msk.bf16.vlgmr.msra.gmra.mrb[4].mxu0 %vm351_vm1, %v21_v11  ;;  %v33_v47 = vld [vmem:[%s11890_s0 + $0xe] sm:$0x1]  ;;  %v34_v48 = vld [vmem:[%s11890_s0 + $0xf] sm:$0x1]  ;;  %v9746_v52 = vld [vmem:[%s11891_s1 + $0x118] sm:$0xff]  }
  0x12   :  { %8713 = vmatmul.mubr.msk.bf16.vlgmr.msra.gmra.mrb[4].mxu1 %vm351_vm1, %v22_v12  ;;  %8717 = vmatpush3.bf16.msra.mxu0 %v9719_v13  ;;  %v9745_v51 = vld [vmem:[%s11891_s1 + $0x108] sm:$0xff]   ;;  %v35_v53 = vld [vmem:[%s11890_s0 + $0x10] sm:$0x1]  ;;  %v36_v54 = vld [vmem:[%s11890_s0 + $0x11] sm:$0x1] }
  0x13   :  { %8725 = vmatpush3.bf16.msra.mxu1 %v9720_v14  ;;  %8718 = vmatprep.subr.bf16.mxu0 %v9991_v1  ;;  %v9747_v55 = vld [vmem:[%s11891_s1 + $0x120] sm:$0xff]   ;;  %v9748_v56 = vld [vmem:[%s11891_s1 + $0x130] sm:$0xff]   ;;  %v9749_v57 = vld [vmem:[%s11891_s1 + $0x128] sm:$0xff]  }
  0x14   :  { %8726 = vmatprep.subr.bf16.mxu1 %v9991_v1  ;;  %8720 = vmatprep.mubr.msk.bf16.mxu0 %vm9992_vm0, %v9991_v1  ;;  %v9750_v58 = vld [vmem:[%s11891_s1 + $0x138] sm:$0xff]   ;;  %v37_v59 = vld [vmem:[%s11890_s0 + $0x12] sm:$0x1]  ;;  %v38_v60 = vld [vmem:[%s11890_s0 + $0x13] sm:$0x1] }
  0x15   :  { %8728 = vmatprep.mubr.msk.bf16.mxu1 %vm9992_vm0, %v9991_v1  ;;  %v9751_v61 = vld [vmem:[%s11891_s1 + $0x140] sm:$0xff]   ;;  %v9752_v62 = vld [vmem:[%s11891_s1 + $0x150] sm:$0xff]   ;;  %v9753_v63 = vld [vmem:[%s11891_s1 + $0x148] sm:$0xff]  }
  0x16   :  { %8719 = vmatpush3.bf16.msra.mxu0 %v9721_v15  ;;  %v9754_v0 = vld [vmem:[%s11891_s1 + $0x158] sm:$0xff]   ;;  %v39_v2 = vld [vmem:[%s11890_s0 + $0x14] sm:$0x1]  ;;  %v40_v3 = vld [vmem:[%s11890_s0 + $0x15] sm:$0x1] }
  0x17   :  { %8727 = vmatpush3.bf16.msra.mxu1 %v9722_v16  ;;  %8732 = vmatprep.subr.bf16.mxu0 %v9991_v1  ;;  %v9755_v4 = vld [vmem:[%s11891_s1 + $0x160] sm:$0xff]   ;;  %v9756_v5 = vld [vmem:[%s11891_s1 + $0x170] sm:$0xff]   ;;  %v9757_v6 = vld [vmem:[%s11891_s1 + $0x168] sm:$0xff]  }
  0x18   :  { %8740 = vmatprep.subr.bf16.mxu1 %v9991_v1  ;;  %v9758_v7 = vld [vmem:[%s11891_s1 + $0x178] sm:$0xff]   ;;  %v41_v8 = vld [vmem:[%s11890_s0 + $0x16] sm:$0x1]  ;;  %v42_v9 = vld [vmem:[%s11890_s0 + $0x17] sm:$0x1] }
  0x19   :  { %8721 = vmatmul.mubr.msk.bf16.vlgmr.msra.gmra.mrb[8].mxu0 %vm351_vm1, %v23_v17  ;;  %v9759_v10 = vld [vmem:[%s11891_s1 + $0x180] sm:$0xff]   ;;  %v9760_v11 = vld [vmem:[%s11891_s1 + $0x190] sm:$0xff]   ;;  %v9761_v12 = vld [vmem:[%s11891_s1 + $0x188] sm:$0xff]  }
  0x1a   :  { %8729 = vmatmul.mubr.msk.bf16.vlgmr.msra.gmra.mrb[8].mxu1 %vm351_vm1, %v24_v18  ;;  %8733 = vmatpush3.bf16.msra.mxu0 %v9723_v19  ;;  %v9762_v13 = vld [vmem:[%s11891_s1 + $0x198] sm:$0xff]   ;;  %v9763_v16 = vld [vmem:[%s11891_s1 + $0x1a0] sm:$0xff]   ;;  %v9764_v17 = vld [vmem:[%s11891_s1 + $0x1b0] sm:$0xff]  }
  0x1b   :  { %8741 = vmatpush3.bf16.msra.mxu1 %v9724_v20  ;;  %8734 = vmatprep.subr.bf16.mxu0 %v9991_v1  ;;  %v43_v14 = vld [vmem:[%s11890_s0 + $0x18] sm:$0x1]  ;;  %v44_v15 = vld [vmem:[%s11890_s0 + $0x19] sm:$0x1]  ;;  %v9765_v18 = vld [vmem:[%s11891_s1 + $0x1a8] sm:$0xff]  }
  0x1c   :  { %8742 = vmatprep.subr.bf16.mxu1 %v9991_v1  ;;  %8736 = vmatprep.mubr.msk.bf16.mxu0 %vm9992_vm0, %v9991_v1  ;;  %v9766_v19 = vld [vmem:[%s11891_s1 + $0x1b8] sm:$0xff]  }
  0x1d   :  { %8744 = vmatprep.mubr.msk.bf16.mxu1 %vm9992_vm0, %v9991_v1  ;;  %v45_v20 = vld [vmem:[%s11890_s0 + $0x1a] sm:$0x1] }
  0x1e   :  { %8735 = vmatpush3.bf16.msra.mxu0 %v9725_v21  ;;  %v9767_v21 = vld [vmem:[%s11891_s1 + $0x1c0] sm:$0xff]  }
  0x1f   :  { %8743 = vmatpush3.bf16.msra.mxu1 %v9726_v22  ;;  %8748 = vmatprep.subr.bf16.mxu0 %v9991_v1  ;;  %v46_v22 = vld [vmem:[%s11890_s0 + $0x1b] sm:$0x1] }
  0x20   :  { %8756 = vmatprep.subr.bf16.mxu1 %v9991_v1 }
  0x21   :  { %8737 = vmatmul.mubr.msk.bf16.vlgmr.msra.gmra.mrb[12].mxu0 %vm351_vm1, %v25_v23  ;;  %v9768_v23 = vld [vmem:[%s11891_s1 + $0x1d0] sm:$0xff]  }
  0x22   :  { %8745 = vmatmul.mubr.msk.bf16.vlgmr.msra.gmra.mrb[12].mxu1 %vm351_vm1, %v26_v24  ;;  %8749 = vmatpush3.bf16.msra.mxu0 %v9727_v25  ;;  %v9769_v24 = vld [vmem:[%s11891_s1 + $0x1c8] sm:$0xff]   ;;  %v9770_v25 = vld [vmem:[%s11891_s1 + $0x1d8] sm:$0xff]  }
  0x23   :  { %8757 = vmatpush3.bf16.msra.mxu1 %v9728_v26  ;;  %8750 = vmatprep.subr.bf16.mxu0 %v9991_v1  ;;  %v47_v26 = vld [vmem:[%s11890_s0 + $0x1c] sm:$0x1] }
  0x24   :  { %8758 = vmatprep.subr.bf16.mxu1 %v9991_v1  ;;  %8752 = vmatprep.mubr.msk.bf16.mxu0 %vm9992_vm0, %v9991_v1 }
  0x25   :  { %8760 = vmatprep.mubr.msk.bf16.mxu1 %vm9992_vm0, %v9991_v1 }
  0x26   :  { %8751 = vmatpush3.bf16.msra.mxu0 %v9729_v27  ;;  %v48_v27 = vld [vmem:[%s11890_s0 + $0x1d] sm:$0x1] }
  0x27   :  { %8759 = vmatpush3.bf16.msra.mxu1 %v9730_v28  ;;  %8764 = vmatprep.subr.bf16.mxu0 %v9991_v1  ;;  %v9771_v28 = vld [vmem:[%s11891_s1 + $0x1e0] sm:$0xff]  }
  0x28   :  { %8772 = vmatprep.subr.bf16.mxu1 %v9991_v1 }
  0x29   :  { %8753 = vmatmul.mubr.msk.bf16.vlgmr.msra.gmra.mrb[16].mxu0 %vm351_vm1, %v27_v29  ;;  %v9772_v29 = vld [vmem:[%s11891_s1 + $0x1f0] sm:$0xff]  }
  0x2a   :  { %8761 = vmatmul.mubr.msk.bf16.vlgmr.msra.gmra.mrb[16].mxu1 %vm351_vm1, %v28_v30  ;;  %8765 = vmatpush3.bf16.msra.mxu0 %v9731_v31  ;;  %v9773_v30 = vld [vmem:[%s11891_s1 + $0x1e8] sm:$0xff]   ;;  %v9774_v31 = vld [vmem:[%s11891_s1 + $0x1f8] sm:$0xff]  }
  0x2b   :  { %8773 = vmatpush3.bf16.msra.mxu1 %v9732_v32  ;;  %8766 = vmatprep.subr.bf16.mxu0 %v9991_v1  ;;  %v49_v32 = vld [vmem:[%s11890_s0 + $0x1e] sm:$0x1] }
  0x2c   :  { %8774 = vmatprep.subr.bf16.mxu1 %v9991_v1  ;;  %8768 = vmatprep.mubr.msk.bf16.mxu0 %vm9992_vm0, %v9991_v1 }
  0x2d   :  { %8776 = vmatprep.mubr.msk.bf16.mxu1 %vm9992_vm0, %v9991_v1 }
  0x2e   :  { %8767 = vmatpush3.bf16.msra.mxu0 %v9733_v33  ;;  %v50_v33 = vld [vmem:[%s11890_s0 + $0x1f] sm:$0x1] }
  0x2f   :  { %8775 = vmatpush3.bf16.msra.mxu1 %v9734_v34  ;;  %8780 = vmatprep.subr.bf16.mxu0 %v9991_v1  ;;  %v9775_v34 = vld [vmem:[%s11891_s1 + $0x200] sm:$0xff]  }
  0x30   :  { %8788 = vmatprep.subr.bf16.mxu1 %v9991_v1 }
  0x31   :  { %8769 = vmatmul.mubr.msk.bf16.vlgmr.msra.gmra.mrb[20].mxu0 %vm351_vm1, %v29_v35  ;;  %v9776_v35 = vld [vmem:[%s11891_s1 + $0x210] sm:$0xff]  }
  0x32   :  { %8777 = vmatmul.mubr.msk.bf16.vlgmr.msra.gmra.mrb[20].mxu1 %vm351_vm1, %v30_v36  ;;  %8781 = vmatpush3.bf16.msra.mxu0 %v9735_v37  ;;  %v9777_v36 = vld [vmem:[%s11891_s1 + $0x208] sm:$0xff]   ;;  %v9778_v37 = vld [vmem:[%s11891_s1 + $0x218] sm:$0xff]  }
  0x33   :  { %8789 = vmatpush3.bf16.msra.mxu1 %v9736_v38  ;;  %8782 = vmatprep.subr.bf16.mxu0 %v9991_v1  ;;  %v51_v38 = vld [vmem:[%s11890_s0 + $0x20] sm:$0x1] }
  0x34   :  { %8790 = vmatprep.subr.bf16.mxu1 %v9991_v1  ;;  %8784 = vmatprep.mubr.msk.bf16.mxu0 %vm9992_vm0, %v9991_v1 }
  0x35   :  { %8792 = vmatprep.mubr.msk.bf16.mxu1 %vm9992_vm0, %v9991_v1 }
  0x36   :  { %8783 = vmatpush3.bf16.msra.mxu0 %v9737_v39  ;;  %v52_v39 = vld [vmem:[%s11890_s0 + $0x21] sm:$0x1] }
  0x37   :  { %8791 = vmatpush3.bf16.msra.mxu1 %v9738_v40  ;;  %8796 = vmatprep.subr.bf16.mxu0 %v9991_v1  ;;  %v9779_v40 = vld [vmem:[%s11891_s1 + $0x220] sm:$0xff]  }
  0x38   :  { %8804 = vmatprep.subr.bf16.mxu1 %v9991_v1 }
  0x39   :  { %8785 = vmatmul.mubr.msk.bf16.vlgmr.msra.gmra.mrb[24].mxu0 %vm351_vm1, %v31_v41  ;;  %v9780_v41 = vld [vmem:[%s11891_s1 + $0x230] sm:$0xff]  }
  0x3a   :  { %8793 = vmatmul.mubr.msk.bf16.vlgmr.msra.gmra.mrb[24].mxu1 %vm351_vm1, %v32_v43  ;;  %8797 = vmatpush3.bf16.msra.mxu0 %v9739_v42  ;;  %v9781_v42 = vld [vmem:[%s11891_s1 + $0x228] sm:$0xff]   ;;  %v9782_v43 = vld [vmem:[%s11891_s1 + $0x238] sm:$0xff]  }
  0x3b   :  { %8805 = vmatpush3.bf16.msra.mxu1 %v9740_v44  ;;  %8798 = vmatprep.subr.bf16.mxu0 %v9991_v1  ;;  %v53_v44 = vld [vmem:[%s11890_s0 + $0x22] sm:$0x1] }
  0x3c   :  { %8806 = vmatprep.subr.bf16.mxu1 %v9991_v1  ;;  %8800 = vmatprep.mubr.msk.bf16.mxu0 %vm9992_vm0, %v9991_v1 }
  0x3d   :  { %8808 = vmatprep.mubr.msk.bf16.mxu1 %vm9992_vm0, %v9991_v1 }
  0x3e   :  { %8799 = vmatpush3.bf16.msra.mxu0 %v9741_v45  ;;  %v54_v45 = vld [vmem:[%s11890_s0 + $0x23] sm:$0x1] }
  0x3f   :  { %8807 = vmatpush3.bf16.msra.mxu1 %v9742_v46  ;;  %8812 = vmatprep.subr.bf16.mxu0 %v9991_v1  ;;  %v9783_v46 = vld [vmem:[%s11891_s1 + $0x240] sm:$0xff]  }
  0x40   :  { %8820 = vmatprep.subr.bf16.mxu1 %v9991_v1 }
  0x41   :  { %8801 = vmatmul.mubr.msk.bf16.vlgmr.msra.gmra.mrb[28].mxu0 %vm351_vm1, %v33_v47  ;;  %v9784_v47 = vld [vmem:[%s11891_s1 + $0x250] sm:$0xff]  }
  0x42   :  { %8809 = vmatmul.mubr.msk.bf16.vlgmr.msra.gmra.mrb[28].mxu1 %vm351_vm1, %v34_v48  ;;  %8813 = vmatpush3.bf16.msra.mxu0 %v9743_v49  ;;  %v9785_v48 = vld [vmem:[%s11891_s1 + $0x248] sm:$0xff]   ;;  %v9786_v49 = vld [vmem:[%s11891_s1 + $0x258] sm:$0xff]  }
  0x43   :  { %8821 = vmatpush3.bf16.msra.mxu1 %v9744_v50  ;;  %8814 = vmatprep.subr.bf16.mxu0 %v9991_v1  ;;  %v55_v50 = vld [vmem:[%s11890_s0 + $0x24] sm:$0x1] }
  0x44   :  { %8822 = vmatprep.subr.bf16.mxu1 %v9991_v1  ;;  %8816 = vmatprep.mubr.msk.bf16.mxu0 %vm9992_vm0, %v9991_v1 }
  0x45   :  { %8824 = vmatprep.mubr.msk.bf16.mxu1 %vm9992_vm0, %v9991_v1 }
  0x46   :  { %8815 = vmatpush3.bf16.msra.mxu0 %v9745_v51  ;;  %v56_v51 = vld [vmem:[%s11890_s0 + $0x25] sm:$0x1] }
  0x47   :  { %8823 = vmatpush3.bf16.msra.mxu1 %v9746_v52  ;;  %8828 = vmatprep.subr.bf16.mxu0 %v9991_v1  ;;  %v9787_v52 = vld [vmem:[%s11891_s1 + $0x260] sm:$0xff]  }
  0x48   :  { %8836 = vmatprep.subr.bf16.mxu1 %v9991_v1 }
  0x49   :  { %8817 = vmatmul.mubr.msk.bf16.vlgmr.msra.gmra.mrb[32].mxu0 %vm351_vm1, %v35_v53  ;;  %v9788_v53 = vld [vmem:[%s11891_s1 + $0x270] sm:$0xff]  }
  0x4a   :  { %8825 = vmatmul.mubr.msk.bf16.vlgmr.msra.gmra.mrb[32].mxu1 %vm351_vm1, %v36_v54  ;;  %8829 = vmatpush3.bf16.msra.mxu0 %v9747_v55  ;;  %v9789_v54 = vld [vmem:[%s11891_s1 + $0x268] sm:$0xff]   ;;  %v9790_v55 = vld [vmem:[%s11891_s1 + $0x278] sm:$0xff]  }
  0x4b   :  { %8837 = vmatpush3.bf16.msra.mxu1 %v9748_v56  ;;  %8830 = vmatprep.subr.bf16.mxu0 %v9991_v1  ;;  %v57_v56 = vld [vmem:[%s11890_s0 + $0x26] sm:$0x1] }
  0x4c   :  { %8838 = vmatprep.subr.bf16.mxu1 %v9991_v1  ;;  %8832 = vmatprep.mubr.msk.bf16.mxu0 %vm9992_vm0, %v9991_v1 }
  0x4d   :  { %8840 = vmatprep.mubr.msk.bf16.mxu1 %vm9992_vm0, %v9991_v1 }
  0x4e   :  { %8831 = vmatpush3.bf16.msra.mxu0 %v9749_v57  ;;  %v58_v57 = vld [vmem:[%s11890_s0 + $0x27] sm:$0x1] }
  0x4f   :  { %8839 = vmatpush3.bf16.msra.mxu1 %v9750_v58  ;;  %8844 = vmatprep.subr.bf16.mxu0 %v9991_v1  ;;  %v9791_v58 = vld [vmem:[%s11891_s1 + $0x280] sm:$0xff]  }
  0x50   :  { %8852 = vmatprep.subr.bf16.mxu1 %v9991_v1 }
  0x51   :  { %8833 = vmatmul.mubr.msk.bf16.vlgmr.msra.gmra.mrb[36].mxu0 %vm351_vm1, %v37_v59  ;;  %v9792_v59 = vld [vmem:[%s11891_s1 + $0x290] sm:$0xff]  }
  0x52   :  { %8841 = vmatmul.mubr.msk.bf16.vlgmr.msra.gmra.mrb[36].mxu1 %vm351_vm1, %v38_v60  ;;  %8845 = vmatpush3.bf16.msra.mxu0 %v9751_v61  ;;  %v9793_v60 = vld [vmem:[%s11891_s1 + $0x288] sm:$0xff]   ;;  %v9794_v61 = vld [vmem:[%s11891_s1 + $0x298] sm:$0xff]  }
  0x53   :  { %8853 = vmatpush3.bf16.msra.mxu1 %v9752_v62  ;;  %8846 = vmatprep.subr.bf16.mxu0 %v9991_v1  ;;  %v59_v62 = vld [vmem:[%s11890_s0 + $0x28] sm:$0x1] }
  0x54   :  { %8854 = vmatprep.subr.bf16.mxu1 %v9991_v1  ;;  %8848 = vmatprep.mubr.msk.bf16.mxu0 %vm9992_vm0, %v9991_v1 }
  0x55   :  { %8856 = vmatprep.mubr.msk.bf16.mxu1 %vm9992_vm0, %v9991_v1 }
  0x56   :  { %8847 = vmatpush3.bf16.msra.mxu0 %v9753_v63  ;;  %v60_v63 = vld [vmem:[%s11890_s0 + $0x29] sm:$0x1] }
  0x57   :  { %8855 = vmatpush3.bf16.msra.mxu1 %v9754_v0  ;;  %8860 = vmatprep.subr.bf16.mxu0 %v9991_v1  ;;  %v9795_v0 = vld [vmem:[%s11891_s1 + $0x2a0] sm:$0xff]  }
  0x58   :  { %8868 = vmatprep.subr.bf16.mxu1 %v9991_v1 }
  0x59   :  { %8849 = vmatmul.mubr.msk.bf16.vlgmr.msra.gmra.mrb[40].mxu0 %vm351_vm1, %v39_v2  ;;  %v9796_v2 = vld [vmem:[%s11891_s1 + $0x2b0] sm:$0xff]  }
  0x5a   :  { %8857 = vmatmul.mubr.msk.bf16.vlgmr.msra.gmra.mrb[40].mxu1 %vm351_vm1, %v40_v3  ;;  %8861 = vmatpush3.bf16.msra.mxu0 %v9755_v4  ;;  %v9797_v3 = vld [vmem:[%s11891_s1 + $0x2a8] sm:$0xff]   ;;  %v9798_v4 = vld [vmem:[%s11891_s1 + $0x2b8] sm:$0xff]  }
  0x5b   :  { %8869 = vmatpush3.bf16.msra.mxu1 %v9756_v5  ;;  %8862 = vmatprep.subr.bf16.mxu0 %v9991_v1  ;;  %v61_v5 = vld [vmem:[%s11890_s0 + $0x2a] sm:$0x1] }
  0x5c   :  { %8870 = vmatprep.subr.bf16.mxu1 %v9991_v1  ;;  %8864 = vmatprep.mubr.msk.bf16.mxu0 %vm9992_vm0, %v9991_v1 }
  0x5d   :  { %8872 = vmatprep.mubr.msk.bf16.mxu1 %vm9992_vm0, %v9991_v1 }
  0x5e   :  { %8863 = vmatpush3.bf16.msra.mxu0 %v9757_v6  ;;  %v62_v6 = vld [vmem:[%s11890_s0 + $0x2b] sm:$0x1] }
  0x5f   :  { %8871 = vmatpush3.bf16.msra.mxu1 %v9758_v7  ;;  %8876 = vmatprep.subr.bf16.mxu0 %v9991_v1  ;;  %v9799_v7 = vld [vmem:[%s11891_s1 + $0x2c0] sm:$0xff]  }
  0x60   :  { %8884 = vmatprep.subr.bf16.mxu1 %v9991_v1 }
  0x61   :  { %8865 = vmatmul.mubr.msk.bf16.vlgmr.msra.gmra.mrb[44].mxu0 %vm351_vm1, %v41_v8  ;;  %v9800_v8 = vld [vmem:[%s11891_s1 + $0x2d0] sm:$0xff]  }
  0x62   :  { %8873 = vmatmul.mubr.msk.bf16.vlgmr.msra.gmra.mrb[44].mxu1 %vm351_vm1, %v42_v9  ;;  %8877 = vmatpush3.bf16.msra.mxu0 %v9759_v10  ;;  %v9801_v9 = vld [vmem:[%s11891_s1 + $0x2c8] sm:$0xff]   ;;  %v9802_v10 = vld [vmem:[%s11891_s1 + $0x2d8] sm:$0xff]  }
  0x63   :  { %8885 = vmatpush3.bf16.msra.mxu1 %v9760_v11  ;;  %8878 = vmatprep.subr.bf16.mxu0 %v9991_v1  ;;  %v63_v11 = vld [vmem:[%s11890_s0 + $0x2c] sm:$0x1] }
  0x64   :  { %8886 = vmatprep.subr.bf16.mxu1 %v9991_v1  ;;  %8880 = vmatprep.mubr.msk.bf16.mxu0 %vm9992_vm0, %v9991_v1 }
  0x65   :  { %8888 = vmatprep.mubr.msk.bf16.mxu1 %vm9992_vm0, %v9991_v1 }
  0x66   :  { %8879 = vmatpush3.bf16.msra.mxu0 %v9761_v12  ;;  %v64_v12 = vld [vmem:[%s11890_s0 + $0x2d] sm:$0x1] }
  0x67   :  { %8887 = vmatpush3.bf16.msra.mxu1 %v9762_v13  ;;  %8892 = vmatprep.subr.bf16.mxu0 %v9991_v1  ;;  %v9803_v13 = vld [vmem:[%s11891_s1 + $0x2e0] sm:$0xff]  }
  0x68   :  { %8900 = vmatprep.subr.bf16.mxu1 %v9991_v1 }
  0x69   :  { %8881 = vmatmul.mubr.msk.bf16.vlgmr.msra.gmra.mrb[48].mxu0 %vm351_vm1, %v43_v14  ;;  %v9804_v14 = vld [vmem:[%s11891_s1 + $0x2f0] sm:$0xff]  }
  0x6a   :  { %8889 = vmatmul.mubr.msk.bf16.vlgmr.msra.gmra.mrb[48].mxu1 %vm351_vm1, %v44_v15  ;;  %8893 = vmatpush3.bf16.msra.mxu0 %v9763_v16  ;;  %v9805_v15 = vld [vmem:[%s11891_s1 + $0x2e8] sm:$0xff]   ;;  %v9806_v16 = vld [vmem:[%s11891_s1 + $0x2f8] sm:$0xff]  }
  0x6b   :  { %8901 = vmatpush3.bf16.msra.mxu1 %v9764_v17  ;;  %8894 = vmatprep.subr.bf16.mxu0 %v9991_v1  ;;  %v65_v17 = vld [vmem:[%s11890_s0 + $0x2e] sm:$0x1] }
  0x6c   :  { %8902 = vmatprep.subr.bf16.mxu1 %v9991_v1  ;;  %8896 = vmatprep.mubr.msk.bf16.mxu0 %vm9992_vm0, %v9991_v1 }
  0x6d   :  { %8904 = vmatprep.mubr.msk.bf16.mxu1 %vm9992_vm0, %v9991_v1 }
  0x6e   :  { %8895 = vmatpush3.bf16.msra.mxu0 %v9765_v18  ;;  %v66_v18 = vld [vmem:[%s11890_s0 + $0x2f] sm:$0x1] }
  0x6f   :  { %8903 = vmatpush3.bf16.msra.mxu1 %v9766_v19  ;;  %8908 = vmatprep.subr.bf16.mxu0 %v9991_v1  ;;  %v9807_v19 = vld [vmem:[%s11891_s1 + $0x300] sm:$0xff]  }
  0x70   :  { %8916 = vmatprep.subr.bf16.mxu1 %v9991_v1 }
  0x71   :  { %8897 = vmatmul.mubr.msk.bf16.vlgmr.msra.gmra.mrb[52].mxu0 %vm351_vm1, %v45_v20  ;;  %v9808_v20 = vld [vmem:[%s11891_s1 + $0x310] sm:$0xff]  }
  0x72   :  { %8905 = vmatmul.mubr.msk.bf16.vlgmr.msra.gmra.mrb[52].mxu1 %vm351_vm1, %v46_v22  ;;  %8909 = vmatpush3.bf16.msra.mxu0 %v9767_v21  ;;  %v9809_v21 = vld [vmem:[%s11891_s1 + $0x308] sm:$0xff]   ;;  %v9810_v22 = vld [vmem:[%s11891_s1 + $0x318] sm:$0xff]  }
  0x73   :  { %8917 = vmatpush3.bf16.msra.mxu1 %v9768_v23  ;;  %8910 = vmatprep.subr.bf16.mxu0 %v9991_v1  ;;  %v67_v23 = vld [vmem:[%s11890_s0 + $0x30] sm:$0x1] }
  0x74   :  { %8918 = vmatprep.subr.bf16.mxu1 %v9991_v1  ;;  %8912 = vmatprep.mubr.msk.bf16.mxu0 %vm9992_vm0, %v9991_v1 }
  0x75   :  { %8920 = vmatprep.mubr.msk.bf16.mxu1 %vm9992_vm0, %v9991_v1 }
  0x76   :  { %8911 = vmatpush3.bf16.msra.mxu0 %v9769_v24  ;;  %v68_v24 = vld [vmem:[%s11890_s0 + $0x31] sm:$0x1] }
  0x77   :  { %8919 = vmatpush3.bf16.msra.mxu1 %v9770_v25  ;;  %8924 = vmatprep.subr.bf16.mxu0 %v9991_v1  ;;  %v9811_v25 = vld [vmem:[%s11891_s1 + $0x320] sm:$0xff]  }
  0x78   :  { %8932 = vmatprep.subr.bf16.mxu1 %v9991_v1 }
  0x79   :  { %8913 = vmatmul.mubr.msk.bf16.vlgmr.msra.gmra.mrb[56].mxu0 %vm351_vm1, %v47_v26  ;;  %v9812_v26 = vld [vmem:[%s11891_s1 + $0x330] sm:$0xff]  }
  0x7a   :  { %8921 = vmatmul.mubr.msk.bf16.vlgmr.msra.gmra.mrb[56].mxu1 %vm351_vm1, %v48_v27  ;;  %8925 = vmatpush3.bf16.msra.mxu0 %v9771_v28  ;;  %v9813_v27 = vld [vmem:[%s11891_s1 + $0x328] sm:$0xff]   ;;  %v9814_v28 = vld [vmem:[%s11891_s1 + $0x338] sm:$0xff]  }
  0x7b   :  { %8933 = vmatpush3.bf16.msra.mxu1 %v9772_v29  ;;  %8926 = vmatprep.subr.bf16.mxu0 %v9991_v1  ;;  %v69_v29 = vld [vmem:[%s11890_s0 + $0x32] sm:$0x1] }
  0x7c   :  { %8934 = vmatprep.subr.bf16.mxu1 %v9991_v1  ;;  %8928 = vmatprep.mubr.msk.bf16.mxu0 %vm9992_vm0, %v9991_v1 }
  0x7d   :  { %8936 = vmatprep.mubr.msk.bf16.mxu1 %vm9992_vm0, %v9991_v1 }
  0x7e   :  { %8927 = vmatpush3.bf16.msra.mxu0 %v9773_v30  ;;  %v70_v30 = vld [vmem:[%s11890_s0 + $0x33] sm:$0x1] }
  0x7f   :  { %8935 = vmatpush3.bf16.msra.mxu1 %v9774_v31  ;;  %8940 = vmatprep.subr.bf16.mxu0 %v9991_v1  ;;  %v9815_v31 = vld [vmem:[%s11891_s1 + $0x340] sm:$0xff]  }
  0x80   :  { %8948 = vmatprep.subr.bf16.mxu1 %v9991_v1 }
  0x81   :  { %8929 = vmatmul.mubr.msk.bf16.vlgmr.msra.gmra.mrb[60].mxu0 %vm351_vm1, %v49_v32  ;;  %v9816_v32 = vld [vmem:[%s11891_s1 + $0x350] sm:$0xff]  }
  0x82   :  { %8937 = vmatmul.mubr.msk.bf16.vlgmr.msra.gmra.mrb[60].mxu1 %vm351_vm1, %v50_v33  ;;  %8941 = vmatpush3.bf16.msra.mxu0 %v9775_v34  ;;  %v9817_v33 = vld [vmem:[%s11891_s1 + $0x348] sm:$0xff]   ;;  %v9818_v34 = vld [vmem:[%s11891_s1 + $0x358] sm:$0xff]  }
  0x83   :  { %8949 = vmatpush3.bf16.msra.mxu1 %v9776_v35  ;;  %8942 = vmatprep.subr.bf16.mxu0 %v9991_v1  ;;  %v71_v35 = vld [vmem:[%s11890_s0 + $0x34] sm:$0x1] }
  0x84   :  { %8950 = vmatprep.subr.bf16.mxu1 %v9991_v1  ;;  %8944 = vmatprep.mubr.msk.bf16.mxu0 %vm9992_vm0, %v9991_v1 }
  0x85   :  { %8952 = vmatprep.mubr.msk.bf16.mxu1 %vm9992_vm0, %v9991_v1 }
  0x86   :  { %8943 = vmatpush3.bf16.msra.mxu0 %v9777_v36  ;;  %v72_v36 = vld [vmem:[%s11890_s0 + $0x35] sm:$0x1] }
  0x87   :  { %8951 = vmatpush3.bf16.msra.mxu1 %v9778_v37  ;;  %8956 = vmatprep.subr.bf16.mxu0 %v9991_v1  ;;  %v9819_v37 = vld [vmem:[%s11891_s1 + $0x360] sm:$0xff]  }
  0x88   :  { %8964 = vmatprep.subr.bf16.mxu1 %v9991_v1 }
  0x89   :  { %8945 = vmatmul.mubr.msk.bf16.vlgmr.msra.gmra.mrb[64].mxu0 %vm351_vm1, %v51_v38  ;;  %v9820_v38 = vld [vmem:[%s11891_s1 + $0x370] sm:$0xff]  }
  0x8a   :  { %8953 = vmatmul.mubr.msk.bf16.vlgmr.msra.gmra.mrb[64].mxu1 %vm351_vm1, %v52_v39  ;;  %8957 = vmatpush3.bf16.msra.mxu0 %v9779_v40  ;;  %v9821_v39 = vld [vmem:[%s11891_s1 + $0x368] sm:$0xff]   ;;  %v9822_v40 = vld [vmem:[%s11891_s1 + $0x378] sm:$0xff]  }
  0x8b   :  { %8965 = vmatpush3.bf16.msra.mxu1 %v9780_v41  ;;  %8958 = vmatprep.subr.bf16.mxu0 %v9991_v1 }
  0x8c   :  { %8966 = vmatprep.subr.bf16.mxu1 %v9991_v1  ;;  %8960 = vmatprep.mubr.msk.bf16.mxu0 %vm9992_vm0, %v9991_v1 }
  0x8d   :  { %8968 = vmatprep.mubr.msk.bf16.mxu1 %vm9992_vm0, %v9991_v1 }
  0x8e   :  { %8959 = vmatpush3.bf16.msra.mxu0 %v9781_v42 }
  0x8f   :  { %8967 = vmatpush3.bf16.msra.mxu1 %v9782_v43  ;;  %8972 = vmatprep.subr.bf16.mxu0 %v9991_v1 }
  0x90   :  { %8980 = vmatprep.subr.bf16.mxu1 %v9991_v1 }
  0x91   :  { %8961 = vmatmul.mubr.msk.bf16.vlgmr.msra.gmra.mrb[68].mxu0 %vm351_vm1, %v53_v44  ;;  %v73_v44 = vld [vmem:[%s11890_s0 + $0x36] sm:$0x1] }
  0x92   :  { %8969 = vmatmul.mubr.msk.bf16.vlgmr.msra.gmra.mrb[68].mxu1 %vm351_vm1, %v54_v45  ;;  %8973 = vmatpush3.bf16.msra.mxu0 %v9783_v46  ;;  %v74_v45 = vld [vmem:[%s11890_s0 + $0x37] sm:$0x1] }
  0x93   :  { %8981 = vmatpush3.bf16.msra.mxu1 %v9784_v47  ;;  %8974 = vmatprep.subr.bf16.mxu0 %v9991_v1 }
  0x94   :  { %8982 = vmatprep.subr.bf16.mxu1 %v9991_v1  ;;  %8976 = vmatprep.mubr.msk.bf16.mxu0 %vm9992_vm0, %v9991_v1 }
  0x95   :  { %8984 = vmatprep.mubr.msk.bf16.mxu1 %vm9992_vm0, %v9991_v1 }
  0x96   :  { %8975 = vmatpush3.bf16.msra.mxu0 %v9785_v48  ;;  %v9823_v48 = vld [vmem:[%s11891_s1 + $0x380] sm:$0xff]  }
  0x97   :  { %8983 = vmatpush3.bf16.msra.mxu1 %v9786_v49  ;;  %8988 = vmatprep.subr.bf16.mxu0 %v9991_v1  ;;  %v9824_v49 = vld [vmem:[%s11891_s1 + $0x390] sm:$0xff]  }
  0x98   :  { %8996 = vmatprep.subr.bf16.mxu1 %v9991_v1 }
  0x99   :  { %8977 = vmatmul.mubr.msk.bf16.vlgmr.msra.gmra.mrb[72].mxu0 %vm351_vm1, %v55_v50 }
  0x9a   :  { %8985 = vmatmul.mubr.msk.bf16.vlgmr.msra.gmra.mrb[72].mxu1 %vm351_vm1, %v56_v51  ;;  %8989 = vmatpush3.bf16.msra.mxu0 %v9787_v52 }
  0x9b   :  { %8997 = vmatpush3.bf16.msra.mxu1 %v9788_v53  ;;  %8990 = vmatprep.subr.bf16.mxu0 %v9991_v1  ;;  %v9825_v53 = vld [vmem:[%s11891_s1 + $0x388] sm:$0xff]  }
  0x9c   :  { %8998 = vmatprep.subr.bf16.mxu1 %v9991_v1  ;;  %8992 = vmatprep.mubr.msk.bf16.mxu0 %vm9992_vm0, %v9991_v1 }
  0x9d   :  { %9000 = vmatprep.mubr.msk.bf16.mxu1 %vm9992_vm0, %v9991_v1 }
  0x9e   :  { %8991 = vmatpush3.bf16.msra.mxu0 %v9789_v54  ;;  %v9826_v54 = vld [vmem:[%s11891_s1 + $0x398] sm:$0xff]  }
  0x9f   :  { %8999 = vmatpush3.bf16.msra.mxu1 %v9790_v55  ;;  %9004 = vmatprep.subr.bf16.mxu0 %v9991_v1 }
  0xa0   :  { %9012 = vmatprep.subr.bf16.mxu1 %v9991_v1 }
  0xa1   :  { %8993 = vmatmul.mubr.msk.bf16.vlgmr.msra.gmra.mrb[76].mxu0 %vm351_vm1, %v57_v56 }
  0xa2   :  { %9001 = vmatmul.mubr.msk.bf16.vlgmr.msra.gmra.mrb[76].mxu1 %vm351_vm1, %v58_v57  ;;  %9005 = vmatpush3.bf16.msra.mxu0 %v9791_v58  ;;  %v75_v58 = vld [vmem:[%s11890_s0 + $0x38] sm:$0x1] }
  0xa3   :  { %9013 = vmatpush3.bf16.msra.mxu1 %v9792_v59  ;;  %9006 = vmatprep.subr.bf16.mxu0 %v9991_v1  ;;  %v76_v59 = vld [vmem:[%s11890_s0 + $0x39] sm:$0x1] }
  0xa4   :  { %9014 = vmatprep.subr.bf16.mxu1 %v9991_v1  ;;  %9008 = vmatprep.mubr.msk.bf16.mxu0 %vm9992_vm0, %v9991_v1 }
  0xa5   :  { %9016 = vmatprep.mubr.msk.bf16.mxu1 %vm9992_vm0, %v9991_v1 }
  0xa6   :  { %9007 = vmatpush3.bf16.msra.mxu0 %v9793_v60 }
  0xa7   :  { %9015 = vmatpush3.bf16.msra.mxu1 %v9794_v61  ;;  %9020 = vmatprep.subr.bf16.mxu0 %v9991_v1 }
  0xa8   :  { %9028 = vmatprep.subr.bf16.mxu1 %v9991_v1 }
  0xa9   :  { %9009 = vmatmul.mubr.msk.bf16.vlgmr.msra.gmra.mrb[80].mxu0 %vm351_vm1, %v59_v62  ;;  %v9827_v62 = vld [vmem:[%s11891_s1 + $0x3a0] sm:$0xff]  }
  0xaa   :  { %9017 = vmatmul.mubr.msk.bf16.vlgmr.msra.gmra.mrb[80].mxu1 %vm351_vm1, %v60_v63  ;;  %9021 = vmatpush3.bf16.msra.mxu0 %v9795_v0  ;;  %v9828_v63 = vld [vmem:[%s11891_s1 + $0x3b0] sm:$0xff]  }
  0xab   :  { %9029 = vmatpush3.bf16.msra.mxu1 %v9796_v2  ;;  %9022 = vmatprep.subr.bf16.mxu0 %v9991_v1 }
  0xac   :  { %9030 = vmatprep.subr.bf16.mxu1 %v9991_v1  ;;  %9024 = vmatprep.mubr.msk.bf16.mxu0 %vm9992_vm0, %v9991_v1 }
  0xad   :  { %9032 = vmatprep.mubr.msk.bf16.mxu1 %vm9992_vm0, %v9991_v1 }
  0xae   :  { %9023 = vmatpush3.bf16.msra.mxu0 %v9797_v3 }
  0xaf   :  { %9031 = vmatpush3.bf16.msra.mxu1 %v9798_v4  ;;  %9036 = vmatprep.subr.bf16.mxu0 %v9991_v1  ;;  %v9829_v4 = vld [vmem:[%s11891_s1 + $0x3a8] sm:$0xff]  }
  0xb0   :  { %9044 = vmatprep.subr.bf16.mxu1 %v9991_v1 }
  0xb1   :  { %9025 = vmatmul.mubr.msk.bf16.vlgmr.msra.gmra.mrb[84].mxu0 %vm351_vm1, %v61_v5  ;;  %v9830_v5 = vld [vmem:[%s11891_s1 + $0x3b8] sm:$0xff]  }
  0xb2   :  { %9033 = vmatmul.mubr.msk.bf16.vlgmr.msra.gmra.mrb[84].mxu1 %vm351_vm1, %v62_v6  ;;  %9037 = vmatpush3.bf16.msra.mxu0 %v9799_v7 }
  0xb3   :  { %9045 = vmatpush3.bf16.msra.mxu1 %v9800_v8  ;;  %9038 = vmatprep.subr.bf16.mxu0 %v9991_v1 }
  0xb4   :  { %9046 = vmatprep.subr.bf16.mxu1 %v9991_v1  ;;  %9040 = vmatprep.mubr.msk.bf16.mxu0 %vm9992_vm0, %v9991_v1 }
  0xb5   :  { %9048 = vmatprep.mubr.msk.bf16.mxu1 %vm9992_vm0, %v9991_v1 }
  0xb6   :  { %9039 = vmatpush3.bf16.msra.mxu0 %v9801_v9  ;;  %v77_v9 = vld [vmem:[%s11890_s0 + $0x3a] sm:$0x1] }
  0xb7   :  { %9047 = vmatpush3.bf16.msra.mxu1 %v9802_v10  ;;  %9052 = vmatprep.subr.bf16.mxu0 %v9991_v1  ;;  %v78_v10 = vld [vmem:[%s11890_s0 + $0x3b] sm:$0x1] }
  0xb8   :  { %9060 = vmatprep.subr.bf16.mxu1 %v9991_v1 }
  0xb9   :  { %9041 = vmatmul.mubr.msk.bf16.vlgmr.msra.gmra.mrb[88].mxu0 %vm351_vm1, %v63_v11 }
  0xba   :  { %9049 = vmatmul.mubr.msk.bf16.vlgmr.msra.gmra.mrb[88].mxu1 %vm351_vm1, %v64_v12  ;;  %9053 = vmatpush3.bf16.msra.mxu0 %v9803_v13  ;;  %v9831_v13 = vld [vmem:[%s11891_s1 + $0x3c0] sm:$0xff]  }
  0xbb   :  { %9061 = vmatpush3.bf16.msra.mxu1 %v9804_v14  ;;  %9054 = vmatprep.subr.bf16.mxu0 %v9991_v1  ;;  %v9832_v14 = vld [vmem:[%s11891_s1 + $0x3d0] sm:$0xff]  }
  0xbc   :  { %9062 = vmatprep.subr.bf16.mxu1 %v9991_v1  ;;  %9056 = vmatprep.mubr.msk.bf16.mxu0 %vm9992_vm0, %v9991_v1 }
  0xbd   :  { %9064 = vmatprep.mubr.msk.bf16.mxu1 %vm9992_vm0, %v9991_v1 }
  0xbe   :  { %9055 = vmatpush3.bf16.msra.mxu0 %v9805_v15 }
  0xbf   :  { %9063 = vmatpush3.bf16.msra.mxu1 %v9806_v16  ;;  %9068 = vmatprep.subr.bf16.mxu0 %v9991_v1 }
  0xc0   :  { %9076 = vmatprep.subr.bf16.mxu1 %v9991_v1 }
  0xc1   :  { %9057 = vmatmul.mubr.msk.bf16.vlgmr.msra.gmra.mrb[92].mxu0 %vm351_vm1, %v65_v17 }
  0xc2   :  { %9065 = vmatmul.mubr.msk.bf16.vlgmr.msra.gmra.mrb[92].mxu1 %vm351_vm1, %v66_v18  ;;  %9069 = vmatpush3.bf16.msra.mxu0 %v9807_v19  ;;  %v9833_v18 = vld [vmem:[%s11891_s1 + $0x3c8] sm:$0xff]   ;;  %v9834_v19 = vld [vmem:[%s11891_s1 + $0x3d8] sm:$0xff]  }
  0xc3   :  { %9077 = vmatpush3.bf16.msra.mxu1 %v9808_v20  ;;  %9070 = vmatprep.subr.bf16.mxu0 %v9991_v1 }
  0xc4   :  { %9078 = vmatprep.subr.bf16.mxu1 %v9991_v1  ;;  %9072 = vmatprep.mubr.msk.bf16.mxu0 %vm9992_vm0, %v9991_v1 }
  0xc5   :  { %9080 = vmatprep.mubr.msk.bf16.mxu1 %vm9992_vm0, %v9991_v1 }
  0xc6   :  { %9071 = vmatpush3.bf16.msra.mxu0 %v9809_v21 }
  0xc7   :  { %9079 = vmatpush3.bf16.msra.mxu1 %v9810_v22  ;;  %9084 = vmatprep.subr.bf16.mxu0 %v9991_v1 }
  0xc8   :  { %9092 = vmatprep.subr.bf16.mxu1 %v9991_v1 }
  0xc9   :  { %9073 = vmatmul.mubr.msk.bf16.vlgmr.msra.gmra.mrb[96].mxu0 %vm351_vm1, %v67_v23  ;;  %v79_v23 = vld [vmem:[%s11890_s0 + $0x3c] sm:$0x1] }
  0xca   :  { %9081 = vmatmul.mubr.msk.bf16.vlgmr.msra.gmra.mrb[96].mxu1 %vm351_vm1, %v68_v24  ;;  %9085 = vmatpush3.bf16.msra.mxu0 %v9811_v25  ;;  %v80_v24 = vld [vmem:[%s11890_s0 + $0x3d] sm:$0x1] }
  0xcb   :  { %9093 = vmatpush3.bf16.msra.mxu1 %v9812_v26  ;;  %9086 = vmatprep.subr.bf16.mxu0 %v9991_v1 }
  0xcc   :  { %9094 = vmatprep.subr.bf16.mxu1 %v9991_v1  ;;  %9088 = vmatprep.mubr.msk.bf16.mxu0 %vm9992_vm0, %v9991_v1 }
  0xcd   :  { %9096 = vmatprep.mubr.msk.bf16.mxu1 %vm9992_vm0, %v9991_v1 }
  0xce   :  { %9087 = vmatpush3.bf16.msra.mxu0 %v9813_v27  ;;  %v9835_v27 = vld [vmem:[%s11891_s1 + $0x3e0] sm:$0xff]  }
  0xcf   :  { %9095 = vmatpush3.bf16.msra.mxu1 %v9814_v28  ;;  %9100 = vmatprep.subr.bf16.mxu0 %v9991_v1  ;;  %v9836_v28 = vld [vmem:[%s11891_s1 + $0x3f0] sm:$0xff]  }
  0xd0   :  { %9108 = vmatprep.subr.bf16.mxu1 %v9991_v1 }
  0xd1   :  { %9089 = vmatmul.mubr.msk.bf16.vlgmr.msra.gmra.mrb[100].mxu0 %vm351_vm1, %v69_v29 }
  0xd2   :  { %9097 = vmatmul.mubr.msk.bf16.vlgmr.msra.gmra.mrb[100].mxu1 %vm351_vm1, %v70_v30  ;;  %9101 = vmatpush3.bf16.msra.mxu0 %v9815_v31 }
  0xd3   :  { %9109 = vmatpush3.bf16.msra.mxu1 %v9816_v32  ;;  %9102 = vmatprep.subr.bf16.mxu0 %v9991_v1  ;;  %v9837_v32 = vld [vmem:[%s11891_s1 + $0x3e8] sm:$0xff]  }
  0xd4   :  { %9110 = vmatprep.subr.bf16.mxu1 %v9991_v1  ;;  %9104 = vmatprep.mubr.msk.bf16.mxu0 %vm9992_vm0, %v9991_v1 }
  0xd5   :  { %9112 = vmatprep.mubr.msk.bf16.mxu1 %vm9992_vm0, %v9991_v1 }
  0xd6   :  { %9103 = vmatpush3.bf16.msra.mxu0 %v9817_v33  ;;  %v9838_v33 = vld [vmem:[%s11891_s1 + $0x3f8] sm:$0xff]  }
  0xd7   :  { %9111 = vmatpush3.bf16.msra.mxu1 %v9818_v34  ;;  %9116 = vmatprep.subr.bf16.mxu0 %v9991_v1 }
  0xd8   :  { %9124 = vmatprep.subr.bf16.mxu1 %v9991_v1 }
  0xd9   :  { %9105 = vmatmul.mubr.msk.bf16.vlgmr.msra.gmra.mrb[104].mxu0 %vm351_vm1, %v71_v35 }
  0xda   :  { %9113 = vmatmul.mubr.msk.bf16.vlgmr.msra.gmra.mrb[104].mxu1 %vm351_vm1, %v72_v36  ;;  %9117 = vmatpush3.bf16.msra.mxu0 %v9819_v37  ;;  %v81_v37 = vld [vmem:[%s11890_s0 + $0x3e] sm:$0x1] }
  0xdb   :  { %9125 = vmatpush3.bf16.msra.mxu1 %v9820_v38  ;;  %9118 = vmatprep.subr.bf16.mxu0 %v9991_v1  ;;  %v82_v38 = vld [vmem:[%s11890_s0 + $0x3f] sm:$0x1] }
  0xdc   :  { %v10790_v41 = vpop.f32.mrb[0].mxu0  ;;  %9126 = vmatprep.subr.bf16.mxu1 %v9991_v1  ;;  %9120 = vmatprep.mubr.msk.bf16.mxu0 %vm9992_vm0, %v9991_v1 }
  0xdd   :  { %v10795_v42 = vpop.f32.mrb[0].mxu1  ;;  %v8690_v43 = vpop.f32.mrb[1].mxu0  ;;  %9128 = vmatprep.mubr.msk.bf16.mxu1 %vm9992_vm0, %v9991_v1 }
  0xde   :  { %v8698_v46 = vpop.f32.mrb[1].mxu1  ;;  %v392_v47 = vpop.f32.mrb[2].mxu0  ;;  %9119 = vmatpush3.bf16.msra.mxu0 %v9821_v39  ;;  %v9839_v43 = vld [vmem:[%s11892_s2] sm:$0xff]  }
  0xdf   :  { %v447_v50 = vpop.f32.mrb[2].mxu1  ;;  %9127 = vmatpush3.bf16.msra.mxu1 %v9822_v40  ;;  %v8691_v51 = vpop.f32.mrb[3].mxu0  ;;  %9132 = vmatprep.subr.bf16.mxu0 %v9991_v1 }
  0xe0   :  { %v8699_v52 = vpop.f32.mrb[3].mxu1  ;;  %9140 = vmatprep.subr.bf16.mxu1 %v9991_v1  ;;  %v9842_v50 = vld [vmem:[%s11892_s2 + $0x18] sm:$0xff]   ;;  %v3861_v51 = vmax.f32 %v10795_v42, 0.0  ;;  %v9843_v42 = vld [vmem:[%s11892_s2 + $0x20] sm:$0xff]  }
  0xe1   :  { %9121 = vmatmul.mubr.msk.bf16.vlgmr.msra.gmra.mrb[108].mxu0 %vm351_vm1, %v73_v44  ;;  %v9840_v44 = vld [vmem:[%s11892_s2 + $0x10] sm:$0xff]  }
  0xe2   :  { %9129 = vmatmul.mubr.msk.bf16.vlgmr.msra.gmra.mrb[108].mxu1 %vm351_vm1, %v74_v45  ;;  %9133 = vmatpush3.bf16.msra.mxu0 %v9823_v48  ;;  %v3860_v48 = vmax.f32 %v10790_v41, 0.0 }
  0xe3   :  { %9141 = vmatpush3.bf16.msra.mxu1 %v9824_v49  ;;  %9134 = vmatprep.subr.bf16.mxu0 %v9991_v1  ;;  %v9841_v49 = vld [vmem:[%s11892_s2 + $0x8] sm:$0xff]  }
  0xe4   :  { %v10822_v55 = vpop.f32.mrb[4].mxu0  ;;  %9142 = vmatprep.subr.bf16.mxu1 %v9991_v1  ;;  %9136 = vmatprep.mubr.msk.bf16.mxu0 %vm9992_vm0, %v9991_v1 }
  0xe5   :  { %v10827_v56 = vpop.f32.mrb[4].mxu1  ;;  %v8706_v57 = vpop.f32.mrb[5].mxu0  ;;  %9144 = vmatprep.mubr.msk.bf16.mxu1 %vm9992_vm0, %v9991_v1 }
  0xe6   :  { %v8714_v60 = vpop.f32.mrb[5].mxu1  ;;  %v502_v61 = vpop.f32.mrb[6].mxu0  ;;  %9135 = vmatpush3.bf16.msra.mxu0 %v9825_v53 }
  0xe7   :  { %v557_v0 = vpop.f32.mrb[6].mxu1  ;;  %9143 = vmatpush3.bf16.msra.mxu1 %v9826_v54  ;;  %v8707_v2 = vpop.f32.mrb[7].mxu0  ;;  %9148 = vmatprep.subr.bf16.mxu0 %v9991_v1 }
  0xe8   :  { %v8715_v3 = vpop.f32.mrb[7].mxu1  ;;  %9156 = vmatprep.subr.bf16.mxu1 %v9991_v1  ;;  %v3862_v0 = vmax.f32 %v10822_v55, 0.0  ;;  %v9845_v2 = vld [vmem:[%s11892_s2 + $0x28] sm:$0xff]  }
  0xe9   :  { %9137 = vmatmul.mubr.msk.bf16.vlgmr.msra.gmra.mrb[112].mxu0 %vm351_vm1, %v75_v58  ;;  %v9844_v58 = vld [vmem:[%s11892_s2 + $0x30] sm:$0xff]   ;;  %v9846_v3 = vld [vmem:[%s11892_s2 + $0x38] sm:$0xff]  }
  0xea   :  { %9145 = vmatmul.mubr.msk.bf16.vlgmr.msra.gmra.mrb[112].mxu1 %vm351_vm1, %v76_v59  ;;  %9149 = vmatpush3.bf16.msra.mxu0 %v9827_v62  ;;  %v3924_v59 = vpack.c.bf16 %v3860_v48, %v3860_v48  ;;  %v3925_v62 = vpack.c.bf16 %v3861_v51, %v3861_v51 }
  0xeb   :  { %9157 = vmatpush3.bf16.msra.mxu1 %v9828_v63  ;;  %9150 = vmatprep.subr.bf16.mxu0 %v9991_v1 }
  0xec   :  { %v10854_v6 = vpop.f32.mrb[8].mxu0  ;;  %9158 = vmatprep.subr.bf16.mxu1 %v9991_v1  ;;  %9152 = vmatprep.mubr.msk.bf16.mxu0 %vm9992_vm0, %v9991_v1 }
  0xed   :  { %v10859_v7 = vpop.f32.mrb[8].mxu1  ;;  %v8722_v8 = vpop.f32.mrb[9].mxu0  ;;  %9160 = vmatprep.mubr.msk.bf16.mxu1 %vm9992_vm0, %v9991_v1 }
  0xee   :  { %v8730_v11 = vpop.f32.mrb[9].mxu1  ;;  %v612_v12 = vpop.f32.mrb[10].mxu0  ;;  %9151 = vmatpush3.bf16.msra.mxu0 %v9829_v4  ;;  %v3863_v4 = vmax.f32 %v10827_v56, 0.0  ;;  %v9847_v56 = vld [vmem:[%s11892_s2 + $0x40] sm:$0xff]  }
  0xef   :  { %v667_v15 = vpop.f32.mrb[10].mxu1  ;;  %9159 = vmatpush3.bf16.msra.mxu1 %v9830_v5  ;;  %v8723_v16 = vpop.f32.mrb[11].mxu0  ;;  %9164 = vmatprep.subr.bf16.mxu0 %v9991_v1  ;;  %v9848_v11 = vld [vmem:[%s11892_s2 + $0x50] sm:$0xff]   ;;  %v3926_v12 = vpack.c.bf16 %v3862_v0, %v3862_v0 }
  0xf0   :  { %v8731_v17 = vpop.f32.mrb[11].mxu1  ;;  %9172 = vmatprep.subr.bf16.mxu1 %v9991_v1  ;;  %v3927_v15 = vpack.c.bf16 %v3863_v4, %v3863_v4 }
  0xf1   :  { %9153 = vmatmul.mubr.msk.bf16.vlgmr.msra.gmra.mrb[116].mxu0 %vm351_vm1, %v77_v9 }
  0xf2   :  { %9161 = vmatmul.mubr.msk.bf16.vlgmr.msra.gmra.mrb[116].mxu1 %vm351_vm1, %v78_v10  ;;  %9165 = vmatpush3.bf16.msra.mxu0 %v9831_v13 }
  0xf3   :  { %9173 = vmatpush3.bf16.msra.mxu1 %v9832_v14  ;;  %9166 = vmatprep.subr.bf16.mxu0 %v9991_v1 }
  0xf4   :  { %v10886_v20 = vpop.f32.mrb[12].mxu0  ;;  %9174 = vmatprep.subr.bf16.mxu1 %v9991_v1  ;;  %9168 = vmatprep.mubr.msk.bf16.mxu0 %vm9992_vm0, %v9991_v1 }
  0xf5   :  { %v10891_v21 = vpop.f32.mrb[12].mxu1  ;;  %v8738_v22 = vpop.f32.mrb[13].mxu0  ;;  %9176 = vmatprep.mubr.msk.bf16.mxu1 %vm9992_vm0, %v9991_v1 }
  0xf6   :  { %v8746_v25 = vpop.f32.mrb[13].mxu1  ;;  %v722_v26 = vpop.f32.mrb[14].mxu0  ;;  %9167 = vmatpush3.bf16.msra.mxu0 %v9833_v18 }
  0xf7   :  { %v777_v29 = vpop.f32.mrb[14].mxu1  ;;  %9175 = vmatpush3.bf16.msra.mxu1 %v9834_v19  ;;  %v8739_v30 = vpop.f32.mrb[15].mxu0  ;;  %9180 = vmatprep.subr.bf16.mxu0 %v9991_v1 }
  0xf8   :  { %v8747_v31 = vpop.f32.mrb[15].mxu1  ;;  %9188 = vmatprep.subr.bf16.mxu1 %v9991_v1 }
  0xf9   :  { %9169 = vmatmul.mubr.msk.bf16.vlgmr.msra.gmra.mrb[120].mxu0 %vm351_vm1, %v79_v23 }
  0xfa   :  { %9177 = vmatmul.mubr.msk.bf16.vlgmr.msra.gmra.mrb[120].mxu1 %vm351_vm1, %v80_v24  ;;  %9181 = vmatpush3.bf16.msra.mxu0 %v9835_v27 }
  0xfb   :  { %9189 = vmatpush3.bf16.msra.mxu1 %v9836_v28  ;;  %9182 = vmatprep.subr.bf16.mxu0 %v9991_v1 }
  0xfc   :  { %v10918_v34 = vpop.f32.mrb[16].mxu0  ;;  %9190 = vmatprep.subr.bf16.mxu1 %v9991_v1  ;;  %9184 = vmatprep.mubr.msk.bf16.mxu0 %vm9992_vm0, %v9991_v1 }
  0xfd   :  { %v10923_v35 = vpop.f32.mrb[16].mxu1  ;;  %v8754_v36 = vpop.f32.mrb[17].mxu0  ;;  %9192 = vmatprep.mubr.msk.bf16.mxu1 %vm9992_vm0, %v9991_v1 }
  0xfe   :  { %v8762_v39 = vpop.f32.mrb[17].mxu1  ;;  %v832_v40 = vpop.f32.mrb[18].mxu0  ;;  %9183 = vmatpush3.bf16.msra.mxu0 %v9837_v32 }
  0xff   :  { %v887_v45 = vpop.f32.mrb[18].mxu1  ;;  %9191 = vmatpush3.bf16.msra.mxu1 %v9838_v33  ;;  %v8755_v46 = vpop.f32.mrb[19].mxu0  ;;  %9196 = vmatprep.subr.bf16.mxu0 %v9991_v1 }
 0x100   :  { %v8763_v47 = vpop.f32.mrb[19].mxu1  ;;  %9204 = vmatprep.subr.bf16.mxu1 %v9991_v1 }
 0x101   :  { %9185 = vmatmul.mubr.msk.bf16.vlgmr.msra.gmra.mrb[124].mxu0 %vm351_vm1, %v81_v37 }
 0x102   :  { %9193 = vmatmul.mubr.msk.bf16.vlgmr.msra.gmra.mrb[124].mxu1 %vm351_vm1, %v82_v38  ;;  %9197 = vmatpush3.bf16.msra.mxu0 %v9839_v43 }
 0x103   :  { %9205 = vmatpush3.bf16.msra.mxu1 %v9840_v44  ;;  %9198 = vmatprep.subr.bf16.mxu0 %v9991_v1 }
 0x104   :  { %v10952_v52 = vpop.f32.mrb[20].mxu0  ;;  %9206 = vmatprep.subr.bf16.mxu1 %v9991_v1  ;;  %9200 = vmatprep.mubr.msk.bf16.mxu0 %vm9992_vm0, %v9991_v1 }
 0x105   :  { %v10957_v41 = vpop.f32.mrb[20].mxu1  ;;  %v8770_v53 = vpop.f32.mrb[21].mxu0  ;;  %9208 = vmatprep.mubr.msk.bf16.mxu1 %vm9992_vm0, %v9991_v1 }
 0x106   :  { %v8778_v54 = vpop.f32.mrb[21].mxu1  ;;  %v942_v57 = vpop.f32.mrb[22].mxu0  ;;  %9199 = vmatpush3.bf16.msra.mxu0 %v9841_v49 }
 0x107   :  { %v997_v60 = vpop.f32.mrb[22].mxu1  ;;  %9207 = vmatpush3.bf16.msra.mxu1 %v9842_v50  ;;  %v8771_v61 = vpop.f32.mrb[23].mxu0  ;;  %9212 = vmatprep.subr.bf16.mxu0 %v9991_v1 }
 0x108   :  { %v8779_v63 = vpop.f32.mrb[23].mxu1  ;;  %9220 = vmatprep.subr.bf16.mxu1 %v9991_v1 }
 0x109   :  { %9201 = vmatmul.mubr.msk.bf16.vlgmr.msra.gmra.mrb[128].mxu0 %vm351_vm1, %v3924_v59 }
 0x10a   :  { %9209 = vmatmul.mubr.msk.bf16.vlgmr.msra.gmra.mrb[128].mxu1 %vm351_vm1, %v3925_v62  ;;  %9213 = vmatpush3.bf16.msra.mxu0 %v9843_v42 }
 0x10b   :  { %9221 = vmatpush3.bf16.msra.mxu1 %v9844_v58  ;;  %9214 = vmatprep.subr.bf16.mxu0 %v9991_v1 }
 0x10c   :  { %v10980_v5 = vpop.f32.mrb[24].mxu0  ;;  %9222 = vmatprep.subr.bf16.mxu1 %v9991_v1  ;;  %9216 = vmatprep.mubr.msk.bf16.mxu0 %vm9992_vm0, %v9991_v1 }
 0x10d   :  { %v10985_v55 = vpop.f32.mrb[24].mxu1  ;;  %v8786_v8 = vpop.f32.mrb[25].mxu0  ;;  %9224 = vmatprep.mubr.msk.bf16.mxu1 %vm9992_vm0, %v9991_v1 }
 0x10e   :  { %v8794_v9 = vpop.f32.mrb[25].mxu1  ;;  %v1052_v10 = vpop.f32.mrb[26].mxu0  ;;  %9215 = vmatpush3.bf16.msra.mxu0 %v9845_v2 }
 0x10f   :  { %v1107_v13 = vpop.f32.mrb[26].mxu1  ;;  %9223 = vmatpush3.bf16.msra.mxu1 %v9846_v3  ;;  %v8787_v14 = vpop.f32.mrb[27].mxu0  ;;  %9228 = vmatprep.subr.bf16.mxu0 %v9991_v1 }
 0x110   :  { %v8795_v16 = vpop.f32.mrb[27].mxu1  ;;  %9236 = vmatprep.subr.bf16.mxu1 %v9991_v1 }
 0x111   :  { %9 = vsyncpa [#allocation3], 0  ;;  %9217 = vmatmul.mubr.msk.bf16.vlgmr.msra.gmra.mrb[132].mxu0 %vm351_vm1, %v3926_v12  ;;  %v9849_v17 = vld [vmem:[%s11892_s2 + $0x48] sm:$0xff]   ;;  %v3864_v18 = vmax.f32 %v10854_v6, 0.0  ;;  %v9850_v19 = vld [vmem:[%s11892_s2 + $0x58] sm:$0xff]   ;;  %v3865_v22 = vmax.f32 %v10859_v7, 0.0 }
 0x112   :  { %9225 = vmatmul.mubr.msk.bf16.vlgmr.msra.gmra.mrb[132].mxu1 %vm351_vm1, %v3927_v15  ;;  %9229 = vmatpush3.bf16.msra.mxu0 %v9847_v56  ;;  %v9851_v7 = vld [vmem:[%s11892_s2 + $0x60] sm:$0xff]   ;;  %v9852_v30 = vld [vmem:[%s11892_s2 + $0x70] sm:$0xff]   ;;  %v9853_v33 = vld [vmem:[%s11892_s2 + $0x68] sm:$0xff]   ;;  %v3866_v36 = vmax.f32 %v10886_v20, 0.0  ;;  %v3867_v38 = vmax.f32 %v10891_v21, 0.0  ;;  %v3868_v53 = vmax.f32 %v10918_v34, 0.0 }
 0x113   :  { %9237 = vmatpush3.bf16.msra.mxu1 %v9848_v11  ;;  %9230 = vmatprep.subr.bf16.mxu0 %v9991_v1  ;;  %v3928_v27 = vpack.c.bf16 %v3864_v18, %v3864_v18  ;;  %v3929_v31 = vpack.c.bf16 %v3865_v22, %v3865_v22  ;;  %v9854_v37 = vld [vmem:[%s11892_s2 + $0x78] sm:$0xff]   ;;  %v9855_v21 = vld [vmem:[%s11892_s2 + $0x80] sm:$0xff]   ;;  %v9856_v48 = vld [vmem:[%s11892_s2 + $0x90] sm:$0xff]   ;;  %v3869_v57 = vmax.f32 %v10923_v35, 0.0  ;;  %v3870_v8 = vmax.f32 %v10952_v52, 0.0  ;;  %s9993_s12 = smov [#allocation2]  }
 0x114   :  { %v11008_v23 = vpop.f32.mrb[28].mxu0  ;;  %9238 = vmatprep.subr.bf16.mxu1 %v9991_v1  ;;  %9232 = vmatprep.mubr.msk.bf16.mxu0 %vm9992_vm0, %v9991_v1  ;;  %v3930_v45 = vpack.c.bf16 %v3866_v36, %v3866_v36  ;;  %v3931_v49 = vpack.c.bf16 %v3867_v38, %v3867_v38  ;;  %v9857_v51 = vld [vmem:[%s11892_s2 + $0x88] sm:$0xff]   ;;  %v9858_v54 = vld [vmem:[%s11892_s2 + $0x98] sm:$0xff]   ;;  %v9859_v35 = vld [vmem:[%s11892_s2 + $0xa0] sm:$0xff]   ;;  %v3932_v61 = vpack.c.bf16 %v3868_v53, %v3868_v53  ;;  %v3871_v10 = vmax.f32 %v10957_v41, 0.0  ;;  %s7907_s13 = sshll.u32 %s9993_s12, 4  ;;  %s7908_s13 = int_to_ptr.vmem [resolvable:$true] %s7907_s13 }
 0x115   :  { %v11013_v24 = vpop.f32.mrb[28].mxu1  ;;  %v8802_v25 = vpop.f32.mrb[29].mxu0  ;;  %9240 = vmatprep.mubr.msk.bf16.mxu1 %vm9992_vm0, %v9991_v1  ;;  %v9860_v0 = vld [vmem:[%s11892_s2 + $0xb0] sm:$0xff]   ;;  %v3933_v2 = vpack.c.bf16 %v3869_v57, %v3869_v57  ;;  %v9861_v4 = vld [vmem:[%s11892_s2 + $0xa8] sm:$0xff]   ;;  %v9862_v9 = vld [vmem:[%s11892_s2 + $0xb8] sm:$0xff]   ;;  %v3934_v14 = vpack.c.bf16 %v3870_v8, %v3870_v8  ;;  %vm7764_vm2 = vcmask 1041408   ;;  %p9972_p1 = scmp.lt.s32.totalorder %s7908_s13, %s7908_s13 }
 0x116   :  { %v8810_v6 = vpop.f32.mrb[29].mxu1  ;;  %v1162_v26 = vpop.f32.mrb[30].mxu0  ;;  %9231 = vmatpush3.bf16.msra.mxu0 %v9849_v17  ;;  %v9863_v41 = vld [vmem:[%s11892_s2 + $0xc0] sm:$0xff]   ;;  %v9864_v17 = vld [vmem:[%s11892_s2 + $0xd0] sm:$0xff]   ;;  %v3935_v18 = vpack.c.bf16 %v3871_v10, %v3871_v10  ;;  %v9865_v22 = vld [vmem:[%s11892_s2 + $0xc8] sm:$0xff]   ;;  %v3872_v25 = vmax.f32 %v10980_v5, 0.0 }
 0x117   :  { %v1217_v28 = vpop.f32.mrb[30].mxu1  ;;  %9239 = vmatpush3.bf16.msra.mxu1 %v9850_v19  ;;  %v8803_v29 = vpop.f32.mrb[31].mxu0  ;;  %9244 = vmatprep.subr.bf16.mxu0 %v9991_v1  ;;  %v9866_v6 = vld [vmem:[%s11892_s2 + $0xd8] sm:$0xff]   ;;  %v3873_v26 = vmax.f32 %v10985_v55, 0.0  ;;  %v9867_v55 = vld [vmem:[%s11892_s2 + $0xe0] sm:$0xff]   ;;  %v9869_v38 = vld [vmem:[%s11892_s2 + $0xe8] sm:$0xff]  }
 0x118   :  { %v8811_v32 = vpop.f32.mrb[31].mxu1  ;;  %9252 = vmatprep.subr.bf16.mxu1 %v9991_v1  ;;  %v9873_v57 = vld [vmem:[%s11892_s2 + $0x108] sm:$0xff]   ;;  %s9967_s14 = scalar_lea.vmem %s7908_s13, 32 }
 0x119   :  { %9233 = vmatmul.mubr.msk.bf16.vlgmr.msra.gmra.mrb[136].mxu0 %vm351_vm1, %v3928_v27  ;;  %v3937_v36 = vpack.c.bf16 %v3873_v26, %v3873_v26  ;;  %v9877_v10 = vld [vmem:[%s11892_s2 + $0x128] sm:$0xff]   ;;  %p9968_p0 = scmp.ne.s32.totalorder %s7908_s13, %s9967_s14  ;;  %p9973_p2 = scmp.lt.s32.totalorder %s9967_s14, %s9967_s14 }
 0x11a   :  { %9241 = vmatmul.mubr.msk.bf16.vlgmr.msra.gmra.mrb[136].mxu1 %vm351_vm1, %v3929_v31  ;;  %9245 = vmatpush3.bf16.msra.mxu0 %v9851_v7  ;;  %v9881_v26 = vld [vmem:[%s11892_s2 + $0x148] sm:$0xff]  }
 0x11b   :  { %9253 = vmatpush3.bf16.msra.mxu1 %v9852_v30  ;;  %9246 = vmatprep.subr.bf16.mxu0 %v9991_v1  ;;  %v3936_v30 = vpack.c.bf16 %v3872_v25, %v3872_v25  ;;  %p9974_p3 = por %p9973_p2, %p9972_p1 }
 0x11c   :  { %v11036_v39 = vpop.f32.mrb[32].mxu0  ;;  %9254 = vmatprep.subr.bf16.mxu1 %v9991_v1  ;;  %9248 = vmatprep.mubr.msk.bf16.mxu0 %vm9992_vm0, %v9991_v1 }
 0x11d   :  { %v11041_v40 = vpop.f32.mrb[32].mxu1  ;;  %v8818_v43 = vpop.f32.mrb[33].mxu0  ;;  %9256 = vmatprep.mubr.msk.bf16.mxu1 %vm9992_vm0, %v9991_v1  ;;  %p9975_p4 = pnand %p9974_p3, %p9968_p0 }
 0x11e   :  { %v8826_v20 = vpop.f32.mrb[33].mxu1  ;;  %v1272_v44 = vpop.f32.mrb[34].mxu0  ;;  %9247 = vmatpush3.bf16.msra.mxu0 %v9853_v33  ;;  %v9868_v33 = vld [vmem:[%s11892_s2 + $0xf0] sm:$0xff]   ;;  %v3874_v43 = vmax.f32 %v11008_v23, 0.0 }
 0x11f   :  { %v1327_v46 = vpop.f32.mrb[34].mxu1  ;;  %9255 = vmatpush3.bf16.msra.mxu1 %v9854_v37  ;;  %v8819_v47 = vpop.f32.mrb[35].mxu0  ;;  %9260 = vmatprep.subr.bf16.mxu0 %v9991_v1  ;;  %v9870_v20 = vld [vmem:[%s11892_s2 + $0xf8] sm:$0xff]   ;;  %v3875_v44 = vmax.f32 %v11013_v24, 0.0  ;;  %v9871_v24 = vld [vmem:[%s11892_s2 + $0x100] sm:$0xff]  }
 0x120   :  { %v8827_v50 = vpop.f32.mrb[35].mxu1  ;;  %9268 = vmatprep.subr.bf16.mxu1 %v9991_v1 }
 0x121   :  { %9249 = vmatmul.mubr.msk.bf16.vlgmr.msra.gmra.mrb[140].mxu0 %vm351_vm1, %v3930_v45  ;;  %v3939_v53 = vpack.c.bf16 %v3875_v44, %v3875_v44  ;;  %v9885_v44 = vld [vmem:[%s11892_s2 + $0x168] sm:$0xff]  }
 0x122   :  { %9257 = vmatmul.mubr.msk.bf16.vlgmr.msra.gmra.mrb[140].mxu1 %vm351_vm1, %v3931_v49  ;;  %9261 = vmatpush3.bf16.msra.mxu0 %v9855_v21 }
 0x123   :  { %9269 = vmatpush3.bf16.msra.mxu1 %v9856_v48  ;;  %9262 = vmatprep.subr.bf16.mxu0 %v9991_v1  ;;  %v3938_v48 = vpack.c.bf16 %v3874_v43, %v3874_v43 }
 0x124   :  { %v11064_v42 = vpop.f32.mrb[36].mxu0  ;;  %9270 = vmatprep.subr.bf16.mxu1 %v9991_v1  ;;  %9264 = vmatprep.mubr.msk.bf16.mxu0 %vm9992_vm0, %v9991_v1 }
 0x125   :  { %v11069_v58 = vpop.f32.mrb[36].mxu1  ;;  %v8834_v59 = vpop.f32.mrb[37].mxu0  ;;  %9272 = vmatprep.mubr.msk.bf16.mxu1 %vm9992_vm0, %v9991_v1 }
 0x126   :  { %v8842_v34 = vpop.f32.mrb[37].mxu1  ;;  %v1382_v60 = vpop.f32.mrb[38].mxu0  ;;  %9263 = vmatpush3.bf16.msra.mxu0 %v9857_v51  ;;  %v9872_v51 = vld [vmem:[%s11892_s2 + $0x110] sm:$0xff]   ;;  %v3876_v59 = vmax.f32 %v11036_v39, 0.0 }
 0x127   :  { %v1437_v62 = vpop.f32.mrb[38].mxu1  ;;  %9271 = vmatpush3.bf16.msra.mxu1 %v9858_v54  ;;  %v8835_v63 = vpop.f32.mrb[39].mxu0  ;;  %9276 = vmatprep.subr.bf16.mxu0 %v9991_v1  ;;  %v9874_v34 = vld [vmem:[%s11892_s2 + $0x118] sm:$0xff]   ;;  %v3877_v60 = vmax.f32 %v11041_v40, 0.0  ;;  %v9875_v40 = vld [vmem:[%s11892_s2 + $0x120] sm:$0xff]  }
 0x128   :  { %v8843_v3 = vpop.f32.mrb[39].mxu1  ;;  %9284 = vmatprep.subr.bf16.mxu1 %v9991_v1 }
 0x129   :  { %9265 = vmatmul.mubr.msk.bf16.vlgmr.msra.gmra.mrb[144].mxu0 %vm351_vm1, %v3932_v61  ;;  %v3941_v8 = vpack.c.bf16 %v3877_v60, %v3877_v60  ;;  %v9889_v60 = vld [vmem:[%s11892_s2 + $0x188] sm:$0xff]  }
 0x12a   :  { %9273 = vmatmul.mubr.msk.bf16.vlgmr.msra.gmra.mrb[144].mxu1 %vm351_vm1, %v3933_v2  ;;  %9277 = vmatpush3.bf16.msra.mxu0 %v9859_v35 }
 0x12b   :  { %9285 = vmatpush3.bf16.msra.mxu1 %v9860_v0  ;;  %9278 = vmatprep.subr.bf16.mxu0 %v9991_v1  ;;  %v3940_v0 = vpack.c.bf16 %v3876_v59, %v3876_v59 }
 0x12c   :  { %v11092_v56 = vpop.f32.mrb[40].mxu0  ;;  %9286 = vmatprep.subr.bf16.mxu1 %v9991_v1  ;;  %9280 = vmatprep.mubr.msk.bf16.mxu0 %vm9992_vm0, %v9991_v1 }
 0x12d   :  { %v11097_v11 = vpop.f32.mrb[40].mxu1  ;;  %v8850_v12 = vpop.f32.mrb[41].mxu0  ;;  %9288 = vmatprep.mubr.msk.bf16.mxu1 %vm9992_vm0, %v9991_v1 }
 0x12e   :  { %v8858_v52 = vpop.f32.mrb[41].mxu1  ;;  %v1492_v13 = vpop.f32.mrb[42].mxu0  ;;  %9279 = vmatpush3.bf16.msra.mxu0 %v9861_v4  ;;  %v9876_v4 = vld [vmem:[%s11892_s2 + $0x130] sm:$0xff]   ;;  %v3878_v12 = vmax.f32 %v11064_v42, 0.0 }
 0x12f   :  { %v1547_v15 = vpop.f32.mrb[42].mxu1  ;;  %9287 = vmatpush3.bf16.msra.mxu1 %v9862_v9  ;;  %v8851_v16 = vpop.f32.mrb[43].mxu0  ;;  %9292 = vmatprep.subr.bf16.mxu0 %v9991_v1  ;;  %v9878_v52 = vld [vmem:[%s11892_s2 + $0x138] sm:$0xff]   ;;  %v3879_v13 = vmax.f32 %v11069_v58, 0.0  ;;  %v9879_v58 = vld [vmem:[%s11892_s2 + $0x140] sm:$0xff]  }
 0x130   :  { %v8859_v19 = vpop.f32.mrb[43].mxu1  ;;  %9300 = vmatprep.subr.bf16.mxu1 %v9991_v1 }
 0x131   :  { %9281 = vmatmul.mubr.msk.bf16.vlgmr.msra.gmra.mrb[148].mxu0 %vm351_vm1, %v3934_v14  ;;  %v3943_v25 = vpack.c.bf16 %v3879_v13, %v3879_v13  ;;  %v9893_v13 = vld [vmem:[%s11892_s2 + $0x1a8] sm:$0xff]  }
 0x132   :  { %9289 = vmatmul.mubr.msk.bf16.vlgmr.msra.gmra.mrb[148].mxu1 %vm351_vm1, %v3935_v18  ;;  %9293 = vmatpush3.bf16.msra.mxu0 %v9863_v41 }
 0x133   :  { %9301 = vmatpush3.bf16.msra.mxu1 %v9864_v17  ;;  %9294 = vmatprep.subr.bf16.mxu0 %v9991_v1  ;;  %v3942_v17 = vpack.c.bf16 %v3878_v12, %v3878_v12 }
 0x134   :  { %v11120_v7 = vpop.f32.mrb[44].mxu0  ;;  %9302 = vmatprep.subr.bf16.mxu1 %v9991_v1  ;;  %9296 = vmatprep.mubr.msk.bf16.mxu0 %vm9992_vm0, %v9991_v1 }
 0x135   :  { %v11125_v27 = vpop.f32.mrb[44].mxu1  ;;  %v8866_v28 = vpop.f32.mrb[45].mxu0  ;;  %9304 = vmatprep.mubr.msk.bf16.mxu1 %vm9992_vm0, %v9991_v1 }
 0x136   :  { %v8874_v5 = vpop.f32.mrb[45].mxu1  ;;  %v1602_v29 = vpop.f32.mrb[46].mxu0  ;;  %9295 = vmatpush3.bf16.msra.mxu0 %v9865_v22  ;;  %v9880_v22 = vld [vmem:[%s11892_s2 + $0x150] sm:$0xff]   ;;  %v3880_v28 = vmax.f32 %v11092_v56, 0.0 }
 0x137   :  { %v1657_v31 = vpop.f32.mrb[46].mxu1  ;;  %9303 = vmatpush3.bf16.msra.mxu1 %v9866_v6  ;;  %v8867_v32 = vpop.f32.mrb[47].mxu0  ;;  %9308 = vmatprep.subr.bf16.mxu0 %v9991_v1  ;;  %v9882_v5 = vld [vmem:[%s11892_s2 + $0x158] sm:$0xff]   ;;  %v3881_v29 = vmax.f32 %v11097_v11, 0.0  ;;  %v9883_v11 = vld [vmem:[%s11892_s2 + $0x160] sm:$0xff]  }
 0x138   :  { %v8875_v37 = vpop.f32.mrb[47].mxu1  ;;  %9316 = vmatprep.subr.bf16.mxu1 %v9991_v1 }
 0x139   :  { %9297 = vmatmul.mubr.msk.bf16.vlgmr.msra.gmra.mrb[152].mxu0 %vm351_vm1, %v3936_v30  ;;  %v3945_v43 = vpack.c.bf16 %v3881_v29, %v3881_v29  ;;  %v9897_v29 = vld [vmem:[%s11892_s2 + $0x1c8] sm:$0xff]  }
 0x13a   :  { %9305 = vmatmul.mubr.msk.bf16.vlgmr.msra.gmra.mrb[152].mxu1 %vm351_vm1, %v3937_v36  ;;  %9309 = vmatpush3.bf16.msra.mxu0 %v9867_v55 }
 0x13b   :  { %9317 = vmatpush3.bf16.msra.mxu1 %v9868_v33  ;;  %9310 = vmatprep.subr.bf16.mxu0 %v9991_v1  ;;  %v3944_v33 = vpack.c.bf16 %v3880_v28, %v3880_v28 }
 0x13c   :  { %v11148_v21 = vpop.f32.mrb[48].mxu0  ;;  %9318 = vmatprep.subr.bf16.mxu1 %v9991_v1  ;;  %9312 = vmatprep.mubr.msk.bf16.mxu0 %vm9992_vm0, %v9991_v1 }
 0x13d   :  { %v11153_v45 = vpop.f32.mrb[48].mxu1  ;;  %v8882_v46 = vpop.f32.mrb[49].mxu0  ;;  %9320 = vmatprep.mubr.msk.bf16.mxu1 %vm9992_vm0, %v9991_v1 }
 0x13e   :  { %v8890_v23 = vpop.f32.mrb[49].mxu1  ;;  %v1712_v47 = vpop.f32.mrb[50].mxu0  ;;  %9311 = vmatpush3.bf16.msra.mxu0 %v9869_v38  ;;  %v9884_v38 = vld [vmem:[%s11892_s2 + $0x170] sm:$0xff]   ;;  %v3882_v46 = vmax.f32 %v11120_v7, 0.0 }
 0x13f   :  { %v1767_v49 = vpop.f32.mrb[50].mxu1  ;;  %9319 = vmatpush3.bf16.msra.mxu1 %v9870_v20  ;;  %v8883_v50 = vpop.f32.mrb[51].mxu0  ;;  %9324 = vmatprep.subr.bf16.mxu0 %v9991_v1  ;;  %v9886_v23 = vld [vmem:[%s11892_s2 + $0x178] sm:$0xff]   ;;  %v3883_v47 = vmax.f32 %v11125_v27, 0.0  ;;  %v9887_v27 = vld [vmem:[%s11892_s2 + $0x180] sm:$0xff]  }
 0x140   :  { %v8891_v54 = vpop.f32.mrb[51].mxu1  ;;  %9332 = vmatprep.subr.bf16.mxu1 %v9991_v1 }
 0x141   :  { %9313 = vmatmul.mubr.msk.bf16.vlgmr.msra.gmra.mrb[156].mxu0 %vm351_vm1, %v3938_v48  ;;  %v3947_v59 = vpack.c.bf16 %v3883_v47, %v3883_v47  ;;  %v9901_v47 = vld [vmem:[%s11892_s2 + $0x1e8] sm:$0xff]  }
 0x142   :  { %9321 = vmatmul.mubr.msk.bf16.vlgmr.msra.gmra.mrb[156].mxu1 %vm351_vm1, %v3939_v53  ;;  %9325 = vmatpush3.bf16.msra.mxu0 %v9871_v24 }
 0x143   :  { %9333 = vmatpush3.bf16.msra.mxu1 %v9872_v51  ;;  %9326 = vmatprep.subr.bf16.mxu0 %v9991_v1  ;;  %v3946_v51 = vpack.c.bf16 %v3882_v46, %v3882_v46 }
 0x144   :  { %v11176_v35 = vpop.f32.mrb[52].mxu0  ;;  %9334 = vmatprep.subr.bf16.mxu1 %v9991_v1  ;;  %9328 = vmatprep.mubr.msk.bf16.mxu0 %vm9992_vm0, %v9991_v1 }
 0x145   :  { %v11181_v61 = vpop.f32.mrb[52].mxu1  ;;  %v8898_v62 = vpop.f32.mrb[53].mxu0  ;;  %9336 = vmatprep.mubr.msk.bf16.mxu1 %vm9992_vm0, %v9991_v1 }
 0x146   :  { %v8906_v39 = vpop.f32.mrb[53].mxu1  ;;  %v1822_v63 = vpop.f32.mrb[54].mxu0  ;;  %9327 = vmatpush3.bf16.msra.mxu0 %v9873_v57  ;;  %v9888_v57 = vld [vmem:[%s11892_s2 + $0x190] sm:$0xff]   ;;  %v3884_v62 = vmax.f32 %v11148_v21, 0.0 }
 0x147   :  { %v1877_v2 = vpop.f32.mrb[54].mxu1  ;;  %9335 = vmatpush3.bf16.msra.mxu1 %v9874_v34  ;;  %v8899_v3 = vpop.f32.mrb[55].mxu0  ;;  %9340 = vmatprep.subr.bf16.mxu0 %v9991_v1  ;;  %v9890_v39 = vld [vmem:[%s11892_s2 + $0x198] sm:$0xff]   ;;  %v3885_v63 = vmax.f32 %v11153_v45, 0.0  ;;  %v9891_v45 = vld [vmem:[%s11892_s2 + $0x1a0] sm:$0xff]  }
 0x148   :  { %v8907_v9 = vpop.f32.mrb[55].mxu1  ;;  %9348 = vmatprep.subr.bf16.mxu1 %v9991_v1 }
 0x149   :  { %9329 = vmatmul.mubr.msk.bf16.vlgmr.msra.gmra.mrb[160].mxu0 %vm351_vm1, %v3940_v0  ;;  %v3949_v12 = vpack.c.bf16 %v3885_v63, %v3885_v63  ;;  %v9905_v63 = vld [vmem:[%s11892_s2 + $0x208] sm:$0xff]  }
 0x14a   :  { %9337 = vmatmul.mubr.msk.bf16.vlgmr.msra.gmra.mrb[160].mxu1 %vm351_vm1, %v3941_v8  ;;  %9341 = vmatpush3.bf16.msra.mxu0 %v9875_v40 }
 0x14b   :  { %9349 = vmatpush3.bf16.msra.mxu1 %v9876_v4  ;;  %9342 = vmatprep.subr.bf16.mxu0 %v9991_v1  ;;  %v3948_v4 = vpack.c.bf16 %v3884_v62, %v3884_v62 }
 0x14c   :  { %v11204_v41 = vpop.f32.mrb[56].mxu0  ;;  %9350 = vmatprep.subr.bf16.mxu1 %v9991_v1  ;;  %9344 = vmatprep.mubr.msk.bf16.mxu0 %vm9992_vm0, %v9991_v1 }
 0x14d   :  { %v11209_v14 = vpop.f32.mrb[56].mxu1  ;;  %v8914_v15 = vpop.f32.mrb[57].mxu0  ;;  %9352 = vmatprep.mubr.msk.bf16.mxu1 %vm9992_vm0, %v9991_v1 }
 0x14e   :  { %v8922_v42 = vpop.f32.mrb[57].mxu1  ;;  %v1932_v16 = vpop.f32.mrb[58].mxu0  ;;  %9343 = vmatpush3.bf16.msra.mxu0 %v9877_v10  ;;  %v9892_v10 = vld [vmem:[%s11892_s2 + $0x1b0] sm:$0xff]   ;;  %v3886_v15 = vmax.f32 %v11176_v35, 0.0 }
 0x14f   :  { %v1987_v18 = vpop.f32.mrb[58].mxu1  ;;  %9351 = vmatpush3.bf16.msra.mxu1 %v9878_v52  ;;  %v8915_v19 = vpop.f32.mrb[59].mxu0  ;;  %9356 = vmatprep.subr.bf16.mxu0 %v9991_v1  ;;  %v9894_v42 = vld [vmem:[%s11892_s2 + $0x1b8] sm:$0xff]   ;;  %v3887_v16 = vmax.f32 %v11181_v61, 0.0  ;;  %v9895_v61 = vld [vmem:[%s11892_s2 + $0x1c0] sm:$0xff]  }
 0x150   :  { %v8923_v6 = vpop.f32.mrb[59].mxu1  ;;  %9364 = vmatprep.subr.bf16.mxu1 %v9991_v1 }
 0x151   :  { %9345 = vmatmul.mubr.msk.bf16.vlgmr.msra.gmra.mrb[164].mxu0 %vm351_vm1, %v3942_v17  ;;  %v3951_v28 = vpack.c.bf16 %v3887_v16, %v3887_v16  ;;  %v9909_v16 = vld [vmem:[%s11892_s2 + $0x228] sm:$0xff]  }
 0x152   :  { %9353 = vmatmul.mubr.msk.bf16.vlgmr.msra.gmra.mrb[164].mxu1 %vm351_vm1, %v3943_v25  ;;  %9357 = vmatpush3.bf16.msra.mxu0 %v9879_v58 }
 0x153   :  { %9365 = vmatpush3.bf16.msra.mxu1 %v9880_v22  ;;  %9358 = vmatprep.subr.bf16.mxu0 %v9991_v1  ;;  %v3950_v22 = vpack.c.bf16 %v3886_v15, %v3886_v15 }
 0x154   :  { %v11232_v55 = vpop.f32.mrb[60].mxu0  ;;  %9366 = vmatprep.subr.bf16.mxu1 %v9991_v1  ;;  %9360 = vmatprep.mubr.msk.bf16.mxu0 %vm9992_vm0, %v9991_v1 }
 0x155   :  { %v11237_v30 = vpop.f32.mrb[60].mxu1  ;;  %v8930_v31 = vpop.f32.mrb[61].mxu0  ;;  %9368 = vmatprep.mubr.msk.bf16.mxu1 %vm9992_vm0, %v9991_v1 }
 0x156   :  { %v8938_v56 = vpop.f32.mrb[61].mxu1  ;;  %v2042_v32 = vpop.f32.mrb[62].mxu0  ;;  %9359 = vmatpush3.bf16.msra.mxu0 %v9881_v26  ;;  %v9896_v26 = vld [vmem:[%s11892_s2 + $0x1d0] sm:$0xff]   ;;  %v3888_v31 = vmax.f32 %v11204_v41, 0.0 }
 0x157   :  { %v2097_v36 = vpop.f32.mrb[62].mxu1  ;;  %9367 = vmatpush3.bf16.msra.mxu1 %v9882_v5  ;;  %v8931_v37 = vpop.f32.mrb[63].mxu0  ;;  %9372 = vmatprep.subr.bf16.mxu0 %v9991_v1  ;;  %v9898_v56 = vld [vmem:[%s11892_s2 + $0x1d8] sm:$0xff]   ;;  %v3889_v32 = vmax.f32 %v11209_v14, 0.0  ;;  %v9899_v14 = vld [vmem:[%s11892_s2 + $0x1e0] sm:$0xff]  }
 0x158   :  { %v8939_v20 = vpop.f32.mrb[63].mxu1  ;;  %9380 = vmatprep.subr.bf16.mxu1 %v9991_v1 }
 0x159   :  { %9361 = vmatmul.mubr.msk.bf16.vlgmr.msra.gmra.mrb[168].mxu0 %vm351_vm1, %v3944_v33  ;;  %v3953_v46 = vpack.c.bf16 %v3889_v32, %v3889_v32  ;;  %v9913_v32 = vld [vmem:[%s11892_s2 + $0x248] sm:$0xff]  }
 0x15a   :  { %9369 = vmatmul.mubr.msk.bf16.vlgmr.msra.gmra.mrb[168].mxu1 %vm351_vm1, %v3945_v43  ;;  %9373 = vmatpush3.bf16.msra.mxu0 %v9883_v11 }
 0x15b   :  { %9381 = vmatpush3.bf16.msra.mxu1 %v9884_v38  ;;  %9374 = vmatprep.subr.bf16.mxu0 %v9991_v1  ;;  %v3952_v38 = vpack.c.bf16 %v3888_v31, %v3888_v31 }
 0x15c   :  { %v11260_v24 = vpop.f32.mrb[64].mxu0  ;;  %9382 = vmatprep.subr.bf16.mxu1 %v9991_v1  ;;  %9376 = vmatprep.mubr.msk.bf16.mxu0 %vm9992_vm0, %v9991_v1 }
 0x15d   :  { %v11265_v48 = vpop.f32.mrb[64].mxu1  ;;  %v8946_v49 = vpop.f32.mrb[65].mxu0  ;;  %9384 = vmatprep.mubr.msk.bf16.mxu1 %vm9992_vm0, %v9991_v1 }
 0x15e   :  { %v8954_v7 = vpop.f32.mrb[65].mxu1  ;;  %v2152_v50 = vpop.f32.mrb[66].mxu0  ;;  %9375 = vmatpush3.bf16.msra.mxu0 %v9885_v44  ;;  %v9900_v44 = vld [vmem:[%s11892_s2 + $0x1f0] sm:$0xff]   ;;  %v3890_v49 = vmax.f32 %v11232_v55, 0.0 }
 0x15f   :  { %v2207_v53 = vpop.f32.mrb[66].mxu1  ;;  %9383 = vmatpush3.bf16.msra.mxu1 %v9886_v23  ;;  %v8947_v54 = vpop.f32.mrb[67].mxu0  ;;  %9388 = vmatprep.subr.bf16.mxu0 %v9991_v1  ;;  %v9902_v7 = vld [vmem:[%s11892_s2 + $0x1f8] sm:$0xff]   ;;  %v3891_v50 = vmax.f32 %v11237_v30, 0.0  ;;  %v9903_v30 = vld [vmem:[%s11892_s2 + $0x200] sm:$0xff]  }
 0x160   :  { %v8955_v34 = vpop.f32.mrb[67].mxu1  ;;  %9396 = vmatprep.subr.bf16.mxu1 %v9991_v1 }
 0x161   :  { %9377 = vmatmul.mubr.msk.bf16.vlgmr.msra.gmra.mrb[172].mxu0 %vm351_vm1, %v3946_v51  ;;  %v3955_v62 = vpack.c.bf16 %v3891_v50, %v3891_v50  ;;  %v9917_v50 = vld [vmem:[%s11892_s2 + $0x268] sm:$0xff]  }
 0x162   :  { %9385 = vmatmul.mubr.msk.bf16.vlgmr.msra.gmra.mrb[172].mxu1 %vm351_vm1, %v3947_v59  ;;  %9389 = vmatpush3.bf16.msra.mxu0 %v9887_v27 }
 0x163   :  { %9397 = vmatpush3.bf16.msra.mxu1 %v9888_v57  ;;  %9390 = vmatprep.subr.bf16.mxu0 %v9991_v1  ;;  %v3954_v57 = vpack.c.bf16 %v3890_v49, %v3890_v49 }
 0x164   :  { %v11288_v40 = vpop.f32.mrb[68].mxu0  ;;  %9398 = vmatprep.subr.bf16.mxu1 %v9991_v1  ;;  %9392 = vmatprep.mubr.msk.bf16.mxu0 %vm9992_vm0, %v9991_v1 }
 0x165   :  { %v11293_v0 = vpop.f32.mrb[68].mxu1  ;;  %v8962_v2 = vpop.f32.mrb[69].mxu0  ;;  %9400 = vmatprep.mubr.msk.bf16.mxu1 %vm9992_vm0, %v9991_v1 }
 0x166   :  { %v8970_v21 = vpop.f32.mrb[69].mxu1  ;;  %v2262_v3 = vpop.f32.mrb[70].mxu0  ;;  %9391 = vmatpush3.bf16.msra.mxu0 %v9889_v60  ;;  %v9904_v60 = vld [vmem:[%s11892_s2 + $0x210] sm:$0xff]   ;;  %v3892_v2 = vmax.f32 %v11260_v24, 0.0 }
 0x167   :  { %v2317_v8 = vpop.f32.mrb[70].mxu1  ;;  %9399 = vmatpush3.bf16.msra.mxu1 %v9890_v39  ;;  %v8963_v9 = vpop.f32.mrb[71].mxu0  ;;  %9404 = vmatprep.subr.bf16.mxu0 %v9991_v1  ;;  %v9906_v21 = vld [vmem:[%s11892_s2 + $0x218] sm:$0xff]   ;;  %v3893_v3 = vmax.f32 %v11265_v48, 0.0  ;;  %v9907_v48 = vld [vmem:[%s11892_s2 + $0x220] sm:$0xff]  }
 0x168   :  { %v8971_v52 = vpop.f32.mrb[71].mxu1  ;;  %9412 = vmatprep.subr.bf16.mxu1 %v9991_v1 }
 0x169   :  { %9393 = vmatmul.mubr.msk.bf16.vlgmr.msra.gmra.mrb[176].mxu0 %vm351_vm1, %v3948_v4  ;;  %v3957_v15 = vpack.c.bf16 %v3893_v3, %v3893_v3  ;;  %v9921_v3 = vld [vmem:[%s11892_s2 + $0x288] sm:$0xff]  }
 0x16a   :  { %9401 = vmatmul.mubr.msk.bf16.vlgmr.msra.gmra.mrb[176].mxu1 %vm351_vm1, %v3949_v12  ;;  %9405 = vmatpush3.bf16.msra.mxu0 %v9891_v45 }
 0x16b   :  { %9413 = vmatpush3.bf16.msra.mxu1 %v9892_v10  ;;  %9406 = vmatprep.subr.bf16.mxu0 %v9991_v1  ;;  %v3956_v10 = vpack.c.bf16 %v3892_v2, %v3892_v2 }
 0x16c   :  { %v11316_v58 = vpop.f32.mrb[72].mxu0  ;;  %9414 = vmatprep.subr.bf16.mxu1 %v9991_v1  ;;  %9408 = vmatprep.mubr.msk.bf16.mxu0 %vm9992_vm0, %v9991_v1 }
 0x16d   :  { %v11321_v17 = vpop.f32.mrb[72].mxu1  ;;  %v8978_v18 = vpop.f32.mrb[73].mxu0  ;;  %9416 = vmatprep.mubr.msk.bf16.mxu1 %vm9992_vm0, %v9991_v1 }
 0x16e   :  { %v8986_v35 = vpop.f32.mrb[73].mxu1  ;;  %v2372_v19 = vpop.f32.mrb[74].mxu0  ;;  %9407 = vmatpush3.bf16.msra.mxu0 %v9893_v13  ;;  %v9908_v13 = vld [vmem:[%s11892_s2 + $0x230] sm:$0xff]   ;;  %v3894_v18 = vmax.f32 %v11288_v40, 0.0 }
 0x16f   :  { %v2427_v25 = vpop.f32.mrb[74].mxu1  ;;  %9415 = vmatpush3.bf16.msra.mxu1 %v9894_v42  ;;  %v8979_v6 = vpop.f32.mrb[75].mxu0  ;;  %9420 = vmatprep.subr.bf16.mxu0 %v9991_v1  ;;  %v9910_v35 = vld [vmem:[%s11892_s2 + $0x238] sm:$0xff]   ;;  %v3895_v19 = vmax.f32 %v11293_v0, 0.0  ;;  %v9911_v0 = vld [vmem:[%s11892_s2 + $0x240] sm:$0xff]  }
 0x170   :  { %v8987_v5 = vpop.f32.mrb[75].mxu1  ;;  %9428 = vmatprep.subr.bf16.mxu1 %v9991_v1 }
 0x171   :  { %9409 = vmatmul.mubr.msk.bf16.vlgmr.msra.gmra.mrb[180].mxu0 %vm351_vm1, %v3950_v22  ;;  %v3959_v31 = vpack.c.bf16 %v3895_v19, %v3895_v19  ;;  %v9925_v19 = vld [vmem:[%s11892_s2 + $0x2a8] sm:$0xff]  }
 0x172   :  { %9417 = vmatmul.mubr.msk.bf16.vlgmr.msra.gmra.mrb[180].mxu1 %vm351_vm1, %v3951_v28  ;;  %9421 = vmatpush3.bf16.msra.mxu0 %v9895_v61 }
 0x173   :  { %9429 = vmatpush3.bf16.msra.mxu1 %v9896_v26  ;;  %9422 = vmatprep.subr.bf16.mxu0 %v9991_v1  ;;  %v3958_v26 = vpack.c.bf16 %v3894_v18, %v3894_v18 }
 0x174   :  { %v11344_v11 = vpop.f32.mrb[76].mxu0  ;;  %9430 = vmatprep.subr.bf16.mxu1 %v9991_v1  ;;  %9424 = vmatprep.mubr.msk.bf16.mxu0 %vm9992_vm0, %v9991_v1 }
 0x175   :  { %v11349_v33 = vpop.f32.mrb[76].mxu1  ;;  %v8994_v36 = vpop.f32.mrb[77].mxu0  ;;  %9432 = vmatprep.mubr.msk.bf16.mxu1 %vm9992_vm0, %v9991_v1 }
 0x176   :  { %v9002_v41 = vpop.f32.mrb[77].mxu1  ;;  %v2482_v37 = vpop.f32.mrb[78].mxu0  ;;  %9423 = vmatpush3.bf16.msra.mxu0 %v9897_v29  ;;  %v9912_v29 = vld [vmem:[%s11892_s2 + $0x250] sm:$0xff]   ;;  %v3896_v36 = vmax.f32 %v11316_v58, 0.0 }
 0x177   :  { %v2537_v43 = vpop.f32.mrb[78].mxu1  ;;  %9431 = vmatpush3.bf16.msra.mxu1 %v9898_v56  ;;  %v8995_v20 = vpop.f32.mrb[79].mxu0  ;;  %9436 = vmatprep.subr.bf16.mxu0 %v9991_v1  ;;  %v9914_v41 = vld [vmem:[%s11892_s2 + $0x258] sm:$0xff]   ;;  %v3897_v37 = vmax.f32 %v11321_v17, 0.0  ;;  %v9915_v17 = vld [vmem:[%s11892_s2 + $0x260] sm:$0xff]  }
 0x178   :  { %v9003_v23 = vpop.f32.mrb[79].mxu1  ;;  %9444 = vmatprep.subr.bf16.mxu1 %v9991_v1 }
 0x179   :  { %9425 = vmatmul.mubr.msk.bf16.vlgmr.msra.gmra.mrb[184].mxu0 %vm351_vm1, %v3952_v38  ;;  %v3961_v49 = vpack.c.bf16 %v3897_v37, %v3897_v37  ;;  %v9929_v37 = vld [vmem:[%s11892_s2 + $0x2c8] sm:$0xff]  }
 0x17a   :  { %9433 = vmatmul.mubr.msk.bf16.vlgmr.msra.gmra.mrb[184].mxu1 %vm351_vm1, %v3953_v46  ;;  %9437 = vmatpush3.bf16.msra.mxu0 %v9899_v14 }
 0x17b   :  { %9445 = vmatpush3.bf16.msra.mxu1 %v9900_v44  ;;  %9438 = vmatprep.subr.bf16.mxu0 %v9991_v1  ;;  %v3960_v44 = vpack.c.bf16 %v3896_v36, %v3896_v36 }
 0x17c   :  { %v11372_v27 = vpop.f32.mrb[80].mxu0  ;;  %9446 = vmatprep.subr.bf16.mxu1 %v9991_v1  ;;  %9440 = vmatprep.mubr.msk.bf16.mxu0 %vm9992_vm0, %v9991_v1 }
 0x17d   :  { %v11377_v51 = vpop.f32.mrb[80].mxu1  ;;  %v9010_v53 = vpop.f32.mrb[81].mxu0  ;;  %9448 = vmatprep.mubr.msk.bf16.mxu1 %vm9992_vm0, %v9991_v1 }
 0x17e   :  { %v9018_v55 = vpop.f32.mrb[81].mxu1  ;;  %v2592_v54 = vpop.f32.mrb[82].mxu0  ;;  %9439 = vmatpush3.bf16.msra.mxu0 %v9901_v47  ;;  %v9916_v47 = vld [vmem:[%s11892_s2 + $0x270] sm:$0xff]   ;;  %v3898_v53 = vmax.f32 %v11344_v11, 0.0 }
 0x17f   :  { %v2647_v59 = vpop.f32.mrb[82].mxu1  ;;  %9447 = vmatpush3.bf16.msra.mxu1 %v9902_v7  ;;  %v9011_v34 = vpop.f32.mrb[83].mxu0  ;;  %9452 = vmatprep.subr.bf16.mxu0 %v9991_v1  ;;  %v9918_v55 = vld [vmem:[%s11892_s2 + $0x278] sm:$0xff]   ;;  %v3899_v54 = vmax.f32 %v11349_v33, 0.0  ;;  %v9919_v33 = vld [vmem:[%s11892_s2 + $0x280] sm:$0xff]  }
 0x180   :  { %v9019_v39 = vpop.f32.mrb[83].mxu1  ;;  %9460 = vmatprep.subr.bf16.mxu1 %v9991_v1 }
 0x181   :  { %9441 = vmatmul.mubr.msk.bf16.vlgmr.msra.gmra.mrb[188].mxu0 %vm351_vm1, %v3954_v57  ;;  %v3963_v2 = vpack.c.bf16 %v3899_v54, %v3899_v54  ;;  %v9933_v54 = vld [vmem:[%s11892_s2 + $0x2e8] sm:$0xff]  }
 0x182   :  { %9449 = vmatmul.mubr.msk.bf16.vlgmr.msra.gmra.mrb[188].mxu1 %vm351_vm1, %v3955_v62  ;;  %9453 = vmatpush3.bf16.msra.mxu0 %v9903_v30 }
 0x183   :  { %9461 = vmatpush3.bf16.msra.mxu1 %v9904_v60  ;;  %9454 = vmatprep.subr.bf16.mxu0 %v9991_v1  ;;  %v3962_v60 = vpack.c.bf16 %v3898_v53, %v3898_v53 }
 0x184   :  { %v11400_v45 = vpop.f32.mrb[84].mxu0  ;;  %9462 = vmatprep.subr.bf16.mxu1 %v9991_v1  ;;  %9456 = vmatprep.mubr.msk.bf16.mxu0 %vm9992_vm0, %v9991_v1 }
 0x185   :  { %v11405_v4 = vpop.f32.mrb[84].mxu1  ;;  %v9026_v8 = vpop.f32.mrb[85].mxu0  ;;  %9464 = vmatprep.mubr.msk.bf16.mxu1 %vm9992_vm0, %v9991_v1 }
 0x186   :  { %v9034_v24 = vpop.f32.mrb[85].mxu1  ;;  %v2702_v9 = vpop.f32.mrb[86].mxu0  ;;  %9455 = vmatpush3.bf16.msra.mxu0 %v9905_v63  ;;  %v9920_v63 = vld [vmem:[%s11892_s2 + $0x290] sm:$0xff]   ;;  %v3900_v8 = vmax.f32 %v11372_v27, 0.0 }
 0x187   :  { %v2757_v12 = vpop.f32.mrb[86].mxu1  ;;  %9463 = vmatpush3.bf16.msra.mxu1 %v9906_v21  ;;  %v9027_v52 = vpop.f32.mrb[87].mxu0  ;;  %9468 = vmatprep.subr.bf16.mxu0 %v9991_v1  ;;  %v9922_v24 = vld [vmem:[%s11892_s2 + $0x298] sm:$0xff]   ;;  %v3901_v9 = vmax.f32 %v11377_v51, 0.0  ;;  %v9923_v51 = vld [vmem:[%s11892_s2 + $0x2a0] sm:$0xff]  }
 0x188   :  { %v9035_v42 = vpop.f32.mrb[87].mxu1  ;;  %9476 = vmatprep.subr.bf16.mxu1 %v9991_v1 }
 0x189   :  { %9457 = vmatmul.mubr.msk.bf16.vlgmr.msra.gmra.mrb[192].mxu0 %vm351_vm1, %v3956_v10  ;;  %v3965_v18 = vpack.c.bf16 %v3901_v9, %v3901_v9  ;;  %v9937_v9 = vld [vmem:[%s11892_s2 + $0x308] sm:$0xff]  }
 0x18a   :  { %9465 = vmatmul.mubr.msk.bf16.vlgmr.msra.gmra.mrb[192].mxu1 %vm351_vm1, %v3957_v15  ;;  %9469 = vmatpush3.bf16.msra.mxu0 %v9907_v48 }
 0x18b   :  { %9477 = vmatpush3.bf16.msra.mxu1 %v9908_v13  ;;  %9470 = vmatprep.subr.bf16.mxu0 %v9991_v1  ;;  %v3964_v13 = vpack.c.bf16 %v3900_v8, %v3900_v8 }
 0x18c   :  { %v11428_v61 = vpop.f32.mrb[88].mxu0  ;;  %9478 = vmatprep.subr.bf16.mxu1 %v9991_v1  ;;  %9472 = vmatprep.mubr.msk.bf16.mxu0 %vm9992_vm0, %v9991_v1 }
 0x18d   :  { %v11433_v22 = vpop.f32.mrb[88].mxu1  ;;  %v9042_v25 = vpop.f32.mrb[89].mxu0  ;;  %9480 = vmatprep.mubr.msk.bf16.mxu1 %vm9992_vm0, %v9991_v1 }
 0x18e   :  { %v9050_v40 = vpop.f32.mrb[89].mxu1  ;;  %v2812_v6 = vpop.f32.mrb[90].mxu0  ;;  %9471 = vmatpush3.bf16.msra.mxu0 %v9909_v16  ;;  %v9924_v16 = vld [vmem:[%s11892_s2 + $0x2b0] sm:$0xff]   ;;  %v3902_v25 = vmax.f32 %v11400_v45, 0.0 }
 0x18f   :  { %v2867_v28 = vpop.f32.mrb[90].mxu1  ;;  %9479 = vmatpush3.bf16.msra.mxu1 %v9910_v35  ;;  %v9043_v5 = vpop.f32.mrb[91].mxu0  ;;  %9484 = vmatprep.subr.bf16.mxu0 %v9991_v1  ;;  %v9926_v40 = vld [vmem:[%s11892_s2 + $0x2b8] sm:$0xff]   ;;  %v3903_v6 = vmax.f32 %v11405_v4, 0.0  ;;  %v9927_v4 = vld [vmem:[%s11892_s2 + $0x2c0] sm:$0xff]  }
 0x190   :  { %v9051_v56 = vpop.f32.mrb[91].mxu1  ;;  %9492 = vmatprep.subr.bf16.mxu1 %v9991_v1 }
 0x191   :  { %9473 = vmatmul.mubr.msk.bf16.vlgmr.msra.gmra.mrb[196].mxu0 %vm351_vm1, %v3958_v26  ;;  %v3967_v36 = vpack.c.bf16 %v3903_v6, %v3903_v6  ;;  %v9941_v6 = vld [vmem:[%s11892_s2 + $0x328] sm:$0xff]  }
 0x192   :  { %9481 = vmatmul.mubr.msk.bf16.vlgmr.msra.gmra.mrb[196].mxu1 %vm351_vm1, %v3959_v31  ;;  %9485 = vmatpush3.bf16.msra.mxu0 %v9911_v0 }
 0x193   :  { %9493 = vmatpush3.bf16.msra.mxu1 %v9912_v29  ;;  %9486 = vmatprep.subr.bf16.mxu0 %v9991_v1  ;;  %v3966_v29 = vpack.c.bf16 %v3902_v25, %v3902_v25 }
 0x194   :  { %v11456_v14 = vpop.f32.mrb[92].mxu0  ;;  %9494 = vmatprep.subr.bf16.mxu1 %v9991_v1  ;;  %9488 = vmatprep.mubr.msk.bf16.mxu0 %vm9992_vm0, %v9991_v1 }
 0x195   :  { %v11461_v38 = vpop.f32.mrb[92].mxu1  ;;  %v9058_v43 = vpop.f32.mrb[93].mxu0  ;;  %9496 = vmatprep.mubr.msk.bf16.mxu1 %vm9992_vm0, %v9991_v1 }
 0x196   :  { %v9066_v58 = vpop.f32.mrb[93].mxu1  ;;  %v2922_v20 = vpop.f32.mrb[94].mxu0  ;;  %9487 = vmatpush3.bf16.msra.mxu0 %v9913_v32  ;;  %v9928_v32 = vld [vmem:[%s11892_s2 + $0x2d0] sm:$0xff]   ;;  %v3904_v43 = vmax.f32 %v11428_v61, 0.0 }
 0x197   :  { %v2977_v46 = vpop.f32.mrb[94].mxu1  ;;  %9495 = vmatpush3.bf16.msra.mxu1 %v9914_v41  ;;  %v9059_v23 = vpop.f32.mrb[95].mxu0  ;;  %9500 = vmatprep.subr.bf16.mxu0 %v9991_v1  ;;  %v9930_v58 = vld [vmem:[%s11892_s2 + $0x2d8] sm:$0xff]   ;;  %v3905_v20 = vmax.f32 %v11433_v22, 0.0  ;;  %v9931_v22 = vld [vmem:[%s11892_s2 + $0x2e0] sm:$0xff]  }
 0x198   :  { %v9067_v7 = vpop.f32.mrb[95].mxu1  ;;  %9508 = vmatprep.subr.bf16.mxu1 %v9991_v1 }
 0x199   :  { %9489 = vmatmul.mubr.msk.bf16.vlgmr.msra.gmra.mrb[200].mxu0 %vm351_vm1, %v3960_v44  ;;  %v3969_v53 = vpack.c.bf16 %v3905_v20, %v3905_v20  ;;  %v9945_v20 = vld [vmem:[%s11892_s2 + $0x348] sm:$0xff]  }
 0x19a   :  { %9497 = vmatmul.mubr.msk.bf16.vlgmr.msra.gmra.mrb[200].mxu1 %vm351_vm1, %v3961_v49  ;;  %9501 = vmatpush3.bf16.msra.mxu0 %v9915_v17 }
 0x19b   :  { %9509 = vmatpush3.bf16.msra.mxu1 %v9916_v47  ;;  %9502 = vmatprep.subr.bf16.mxu0 %v9991_v1  ;;  %v3968_v47 = vpack.c.bf16 %v3904_v43, %v3904_v43 }
 0x19c   :  { %v11484_v30 = vpop.f32.mrb[96].mxu0  ;;  %9510 = vmatprep.subr.bf16.mxu1 %v9991_v1  ;;  %9504 = vmatprep.mubr.msk.bf16.mxu0 %vm9992_vm0, %v9991_v1 }
 0x19d   :  { %v11489_v57 = vpop.f32.mrb[96].mxu1  ;;  %v9074_v59 = vpop.f32.mrb[97].mxu0  ;;  %9512 = vmatprep.mubr.msk.bf16.mxu1 %vm9992_vm0, %v9991_v1 }
 0x19e   :  { %v9082_v11 = vpop.f32.mrb[97].mxu1  ;;  %v3032_v34 = vpop.f32.mrb[98].mxu0  ;;  %9503 = vmatpush3.bf16.msra.mxu0 %v9917_v50  ;;  %v9932_v50 = vld [vmem:[%s11892_s2 + $0x2f0] sm:$0xff]   ;;  %v3906_v59 = vmax.f32 %v11456_v14, 0.0 }
 0x19f   :  { %v3087_v62 = vpop.f32.mrb[98].mxu1  ;;  %9511 = vmatpush3.bf16.msra.mxu1 %v9918_v55  ;;  %v9075_v39 = vpop.f32.mrb[99].mxu0  ;;  %9516 = vmatprep.subr.bf16.mxu0 %v9991_v1  ;;  %v9934_v11 = vld [vmem:[%s11892_s2 + $0x2f8] sm:$0xff]   ;;  %v3907_v34 = vmax.f32 %v11461_v38, 0.0  ;;  %v9935_v38 = vld [vmem:[%s11892_s2 + $0x300] sm:$0xff]  }
 0x1a0   :  { %v9083_v21 = vpop.f32.mrb[99].mxu1  ;;  %9524 = vmatprep.subr.bf16.mxu1 %v9991_v1 }
 0x1a1   :  { %9505 = vmatmul.mubr.msk.bf16.vlgmr.msra.gmra.mrb[204].mxu0 %vm351_vm1, %v3962_v60  ;;  %v3971_v8 = vpack.c.bf16 %v3907_v34, %v3907_v34  ;;  %v9949_v34 = vld [vmem:[%s11892_s2 + $0x368] sm:$0xff]  }
 0x1a2   :  { %9513 = vmatmul.mubr.msk.bf16.vlgmr.msra.gmra.mrb[204].mxu1 %vm351_vm1, %v3963_v2  ;;  %9517 = vmatpush3.bf16.msra.mxu0 %v9919_v33 }
 0x1a3   :  { %9525 = vmatpush3.bf16.msra.mxu1 %v9920_v63  ;;  %9518 = vmatprep.subr.bf16.mxu0 %v9991_v1  ;;  %v3970_v63 = vpack.c.bf16 %v3906_v59, %v3906_v59 }
 0x1a4   :  { %v11512_v48 = vpop.f32.mrb[100].mxu0  ;;  %9526 = vmatprep.subr.bf16.mxu1 %v9991_v1  ;;  %9520 = vmatprep.mubr.msk.bf16.mxu0 %vm9992_vm0, %v9991_v1 }
 0x1a5   :  { %v11517_v10 = vpop.f32.mrb[100].mxu1  ;;  %v9090_v12 = vpop.f32.mrb[101].mxu0  ;;  %9528 = vmatprep.mubr.msk.bf16.mxu1 %vm9992_vm0, %v9991_v1 }
 0x1a6   :  { %v9098_v27 = vpop.f32.mrb[101].mxu1  ;;  %v3142_v52 = vpop.f32.mrb[102].mxu0  ;;  %9519 = vmatpush3.bf16.msra.mxu0 %v9921_v3  ;;  %v9936_v3 = vld [vmem:[%s11892_s2 + $0x310] sm:$0xff]   ;;  %v3908_v12 = vmax.f32 %v11484_v30, 0.0 }
 0x1a7   :  { %v3197_v15 = vpop.f32.mrb[102].mxu1  ;;  %9527 = vmatpush3.bf16.msra.mxu1 %v9922_v24  ;;  %v9091_v42 = vpop.f32.mrb[103].mxu0  ;;  %9532 = vmatprep.subr.bf16.mxu0 %v9991_v1  ;;  %v9938_v27 = vld [vmem:[%s11892_s2 + $0x318] sm:$0xff]   ;;  %v3909_v52 = vmax.f32 %v11489_v57, 0.0  ;;  %v9939_v57 = vld [vmem:[%s11892_s2 + $0x320] sm:$0xff]  }
 0x1a8   :  { %v9099_v35 = vpop.f32.mrb[103].mxu1  ;;  %9540 = vmatprep.subr.bf16.mxu1 %v9991_v1 }
 0x1a9   :  { %9521 = vmatmul.mubr.msk.bf16.vlgmr.msra.gmra.mrb[208].mxu0 %vm351_vm1, %v3964_v13  ;;  %v3973_v25 = vpack.c.bf16 %v3909_v52, %v3909_v52  ;;  %v9952_v52 = vld [vmem:[%s11892_s2 + $0x390] sm:$0xff]  }
 0x1aa   :  { %9529 = vmatmul.mubr.msk.bf16.vlgmr.msra.gmra.mrb[208].mxu1 %vm351_vm1, %v3965_v18  ;;  %9533 = vmatpush3.bf16.msra.mxu0 %v9923_v51 }
 0x1ab   :  { %9541 = vmatpush3.bf16.msra.mxu1 %v9924_v16  ;;  %9534 = vmatprep.subr.bf16.mxu0 %v9991_v1  ;;  %v3972_v16 = vpack.c.bf16 %v3908_v12, %v3908_v12 }
 0x1ac   :  { %v11540_v0 = vpop.f32.mrb[104].mxu0  ;;  %9542 = vmatprep.subr.bf16.mxu1 %v9991_v1  ;;  %9536 = vmatprep.mubr.msk.bf16.mxu0 %vm9992_vm0, %v9991_v1 }
 0x1ad   :  { %v11545_v26 = vpop.f32.mrb[104].mxu1  ;;  %v9106_v28 = vpop.f32.mrb[105].mxu0  ;;  %9544 = vmatprep.mubr.msk.bf16.mxu1 %vm9992_vm0, %v9991_v1 }
 0x1ae   :  { %v9114_v45 = vpop.f32.mrb[105].mxu1  ;;  %v3252_v5 = vpop.f32.mrb[106].mxu0  ;;  %9535 = vmatpush3.bf16.msra.mxu0 %v9925_v19  ;;  %v9940_v19 = vld [vmem:[%s11892_s2 + $0x330] sm:$0xff]   ;;  %v3910_v28 = vmax.f32 %v11512_v48, 0.0 }
 0x1af   :  { %v3307_v31 = vpop.f32.mrb[106].mxu1  ;;  %9543 = vmatpush3.bf16.msra.mxu1 %v9926_v40  ;;  %v9107_v56 = vpop.f32.mrb[107].mxu0  ;;  %9548 = vmatprep.subr.bf16.mxu0 %v9991_v1  ;;  %v9942_v45 = vld [vmem:[%s11892_s2 + $0x338] sm:$0xff]   ;;  %v3911_v5 = vmax.f32 %v11517_v10, 0.0  ;;  %v9943_v10 = vld [vmem:[%s11892_s2 + $0x340] sm:$0xff]  }
 0x1b0   :  { %v9115_v41 = vpop.f32.mrb[107].mxu1  ;;  %9556 = vmatprep.subr.bf16.mxu1 %v9991_v1 }
 0x1b1   :  { %9537 = vmatmul.mubr.msk.bf16.vlgmr.msra.gmra.mrb[212].mxu0 %vm351_vm1, %v3966_v29  ;;  %v3975_v43 = vpack.c.bf16 %v3911_v5, %v3911_v5 }
 0x1b2   :  { %9545 = vmatmul.mubr.msk.bf16.vlgmr.msra.gmra.mrb[212].mxu1 %vm351_vm1, %v3967_v36  ;;  %9549 = vmatpush3.bf16.msra.mxu0 %v9927_v4 }
 0x1b3   :  { %9557 = vmatpush3.bf16.msra.mxu1 %v9928_v32  ;;  %9550 = vmatprep.subr.bf16.mxu0 %v9991_v1  ;;  %v3974_v32 = vpack.c.bf16 %v3910_v28, %v3910_v28 }
 0x1b4   :  { %v11568_v17 = vpop.f32.mrb[108].mxu0  ;;  %9558 = vmatprep.subr.bf16.mxu1 %v9991_v1  ;;  %9552 = vmatprep.mubr.msk.bf16.mxu0 %vm9992_vm0, %v9991_v1 }
 0x1b5   :  { %v11573_v44 = vpop.f32.mrb[108].mxu1  ;;  %v9122_v46 = vpop.f32.mrb[109].mxu0  ;;  %9560 = vmatprep.mubr.msk.bf16.mxu1 %vm9992_vm0, %v9991_v1 }
 0x1b6   :  { %v9130_v61 = vpop.f32.mrb[109].mxu1  ;;  %v3362_v23 = vpop.f32.mrb[110].mxu0  ;;  %9551 = vmatpush3.bf16.msra.mxu0 %v9929_v37  ;;  %v9944_v37 = vld [vmem:[%s11892_s2 + $0x350] sm:$0xff]   ;;  %v3912_v46 = vmax.f32 %v11540_v0, 0.0 }
 0x1b7   :  { %v3417_v49 = vpop.f32.mrb[110].mxu1  ;;  %9559 = vmatpush3.bf16.msra.mxu1 %v9930_v58  ;;  %v9123_v7 = vpop.f32.mrb[111].mxu0  ;;  %9564 = vmatprep.subr.bf16.mxu0 %v9991_v1  ;;  %v9946_v61 = vld [vmem:[%s11892_s2 + $0x358] sm:$0xff]   ;;  %v3913_v23 = vmax.f32 %v11545_v26, 0.0  ;;  %v9947_v26 = vld [vmem:[%s11892_s2 + $0x360] sm:$0xff]  }
 0x1b8   :  { %v9131_v55 = vpop.f32.mrb[111].mxu1  ;;  %9572 = vmatprep.subr.bf16.mxu1 %v9991_v1 }
 0x1b9   :  { %9553 = vmatmul.mubr.msk.bf16.vlgmr.msra.gmra.mrb[216].mxu0 %vm351_vm1, %v3968_v47  ;;  %v3977_v59 = vpack.c.bf16 %v3913_v23, %v3913_v23 }
 0x1ba   :  { %9561 = vmatmul.mubr.msk.bf16.vlgmr.msra.gmra.mrb[216].mxu1 %vm351_vm1, %v3969_v53  ;;  %9565 = vmatpush3.bf16.msra.mxu0 %v9931_v22 }
 0x1bb   :  { %9573 = vmatpush3.bf16.msra.mxu1 %v9932_v50  ;;  %9566 = vmatprep.subr.bf16.mxu0 %v9991_v1  ;;  %v3976_v50 = vpack.c.bf16 %v3912_v46, %v3912_v46 }
 0x1bc   :  { %v11596_v33 = vpop.f32.mrb[112].mxu0  ;;  %9574 = vmatprep.subr.bf16.mxu1 %v9991_v1  ;;  %9568 = vmatprep.mubr.msk.bf16.mxu0 %vm9992_vm0, %v9991_v1 }
 0x1bd   :  { %v11601_v60 = vpop.f32.mrb[112].mxu1  ;;  %v9138_v62 = vpop.f32.mrb[113].mxu0  ;;  %9576 = vmatprep.mubr.msk.bf16.mxu1 %vm9992_vm0, %v9991_v1 }
 0x1be   :  { %v9146_v14 = vpop.f32.mrb[113].mxu1  ;;  %v3472_v39 = vpop.f32.mrb[114].mxu0  ;;  %9567 = vmatpush3.bf16.msra.mxu0 %v9933_v54  ;;  %v9948_v54 = vld [vmem:[%s11892_s2 + $0x370] sm:$0xff]   ;;  %v3914_v62 = vmax.f32 %v11568_v17, 0.0 }
 0x1bf   :  { %v3527_v2 = vpop.f32.mrb[114].mxu1  ;;  %9575 = vmatpush3.bf16.msra.mxu1 %v9934_v11  ;;  %v9139_v21 = vpop.f32.mrb[115].mxu0  ;;  %9580 = vmatprep.subr.bf16.mxu0 %v9991_v1  ;;  %v9950_v14 = vld [vmem:[%s11892_s2 + $0x378] sm:$0xff]   ;;  %v3915_v39 = vmax.f32 %v11573_v44, 0.0  ;;  %v9951_v44 = vld [vmem:[%s11892_s2 + $0x380] sm:$0xff]  }
 0x1c0   :  { %v9147_v24 = vpop.f32.mrb[115].mxu1  ;;  %9588 = vmatprep.subr.bf16.mxu1 %v9991_v1 }
 0x1c1   :  { %9569 = vmatmul.mubr.msk.bf16.vlgmr.msra.gmra.mrb[220].mxu0 %vm351_vm1, %v3970_v63  ;;  %v3978_v24 = vpack.c.bf16 %v3914_v62, %v3914_v62 }
 0x1c2   :  { %9577 = vmatmul.mubr.msk.bf16.vlgmr.msra.gmra.mrb[220].mxu1 %vm351_vm1, %v3971_v8  ;;  %9581 = vmatpush3.bf16.msra.mxu0 %v9935_v38 }
 0x1c3   :  { %9589 = vmatpush3.bf16.msra.mxu1 %v9936_v3  ;;  %9582 = vmatprep.subr.bf16.mxu0 %v9991_v1 }
 0x1c4   :  { %v11624_v51 = vpop.f32.mrb[116].mxu0  ;;  %9590 = vmatprep.subr.bf16.mxu1 %v9991_v1  ;;  %9584 = vmatprep.mubr.msk.bf16.mxu0 %vm9992_vm0, %v9991_v1 }
 0x1c5   :  { %v11629_v13 = vpop.f32.mrb[116].mxu1  ;;  %v9154_v15 = vpop.f32.mrb[117].mxu0  ;;  %9592 = vmatprep.mubr.msk.bf16.mxu1 %vm9992_vm0, %v9991_v1 }
 0x1c6   :  { %v9162_v30 = vpop.f32.mrb[117].mxu1  ;;  %v3582_v42 = vpop.f32.mrb[118].mxu0  ;;  %9583 = vmatpush3.bf16.msra.mxu0 %v9937_v9  ;;  %v3979_v15 = vpack.c.bf16 %v3915_v39, %v3915_v39 }
 0x1c7   :  { %v3637_v18 = vpop.f32.mrb[118].mxu1  ;;  %9591 = vmatpush3.bf16.msra.mxu1 %v9938_v27  ;;  %v9155_v35 = vpop.f32.mrb[119].mxu0  ;;  %9596 = vmatprep.subr.bf16.mxu0 %v9991_v1  ;;  %v9953_v42 = vld [vmem:[%s11892_s2 + $0x388] sm:$0xff]  }
 0x1c8   :  { %v9163_v40 = vpop.f32.mrb[119].mxu1  ;;  %9604 = vmatprep.subr.bf16.mxu1 %v9991_v1  ;;  %v3917_v18 = vmax.f32 %v11601_v60, 0.0  ;;  %v9955_v60 = vld [vmem:[%s11892_s2 + $0x3a0] sm:$0xff]  }
 0x1c9   :  { %9585 = vmatmul.mubr.msk.bf16.vlgmr.msra.gmra.mrb[224].mxu0 %vm351_vm1, %v3972_v16  ;;  %v9954_v16 = vld [vmem:[%s11892_s2 + $0x398] sm:$0xff]  }
 0x1ca   :  { %9593 = vmatmul.mubr.msk.bf16.vlgmr.msra.gmra.mrb[224].mxu1 %vm351_vm1, %v3973_v25  ;;  %9597 = vmatpush3.bf16.msra.mxu0 %v9939_v57  ;;  %v3916_v57 = vmax.f32 %v11596_v33, 0.0 }
 0x1cb   :  { %9605 = vmatpush3.bf16.msra.mxu1 %v9940_v19  ;;  %9598 = vmatprep.subr.bf16.mxu0 %v9991_v1 }
 0x1cc   :  { %v11652_v4 = vpop.f32.mrb[120].mxu0  ;;  %9606 = vmatprep.subr.bf16.mxu1 %v9991_v1  ;;  %9600 = vmatprep.mubr.msk.bf16.mxu0 %vm9992_vm0, %v9991_v1 }
 0x1cd   :  { %v11657_v29 = vpop.f32.mrb[120].mxu1  ;;  %v9170_v31 = vpop.f32.mrb[121].mxu0  ;;  %9608 = vmatprep.mubr.msk.bf16.mxu1 %vm9992_vm0, %v9991_v1  ;;  %v3920_v62 = vmax.f32 %v11652_v4, 0.0 }
 0x1ce   :  { %v9178_v48 = vpop.f32.mrb[121].mxu1  ;;  %v3692_v56 = vpop.f32.mrb[122].mxu0  ;;  %9599 = vmatpush3.bf16.msra.mxu0 %v9941_v6  ;;  %v3921_v39 = vmax.f32 %v11657_v29, 0.0  ;;  %v9963_v29 = vld [vmem:[%s11892_s2 + $0x3e0] sm:$0xff]  }
 0x1cf   :  { %v3747_v36 = vpop.f32.mrb[122].mxu1  ;;  %9607 = vmatpush3.bf16.msra.mxu1 %v9942_v45  ;;  %v9171_v41 = vpop.f32.mrb[123].mxu0  ;;  %9612 = vmatprep.subr.bf16.mxu0 %v9991_v1  ;;  %v3980_v45 = vpack.c.bf16 %v3916_v57, %v3916_v57  ;;  %v9956_v56 = vld [vmem:[%s11892_s2 + $0x3b0] sm:$0xff]   ;;  %v9966_v57 = vld [vmem:[%s11892_s2 + $0x3f8] sm:$0xff]  }
 0x1d0   :  { %v9179_v58 = vpop.f32.mrb[123].mxu1  ;;  %9620 = vmatprep.subr.bf16.mxu1 %v9991_v1  ;;  %v9957_v41 = vld [vmem:[%s11892_s2 + $0x3a8] sm:$0xff]  }
 0x1d1   :  { %9601 = vmatmul.mubr.msk.bf16.vlgmr.msra.gmra.mrb[228].mxu0 %vm351_vm1, %v3974_v32  ;;  %v3919_v58 = vmax.f32 %v11629_v13, 0.0  ;;  %v9959_v13 = vld [vmem:[%s11892_s2 + $0x3c0] sm:$0xff]  }
 0x1d2   :  { %9609 = vmatmul.mubr.msk.bf16.vlgmr.msra.gmra.mrb[228].mxu1 %vm351_vm1, %v3975_v43  ;;  %9613 = vmatpush3.bf16.msra.mxu0 %v9943_v10  ;;  %v3981_v10 = vpack.c.bf16 %v3917_v18, %v3917_v18  ;;  %v9958_v43 = vld [vmem:[%s11892_s2 + $0x3b8] sm:$0xff]  }
 0x1d3   :  { %9621 = vmatpush3.bf16.msra.mxu1 %v9944_v37  ;;  %9614 = vmatprep.subr.bf16.mxu0 %v9991_v1  ;;  %v3918_v37 = vmax.f32 %v11624_v51, 0.0 }
 0x1d4   :  { %v11680_v22 = vpop.f32.mrb[124].mxu0  ;;  %9622 = vmatprep.subr.bf16.mxu1 %v9991_v1  ;;  %9616 = vmatprep.mubr.msk.bf16.mxu0 %vm9992_vm0, %v9991_v1 }
 0x1d5   :  { %v11685_v47 = vpop.f32.mrb[124].mxu1  ;;  %v9186_v49 = vpop.f32.mrb[125].mxu0  ;;  %9624 = vmatprep.mubr.msk.bf16.mxu1 %vm9992_vm0, %v9991_v1 }
 0x1d6   :  { %v9194_v0 = vpop.f32.mrb[125].mxu1  ;;  %v3802_v7 = vpop.f32.mrb[126].mxu0  ;;  %9615 = vmatpush3.bf16.msra.mxu0 %v9945_v20 }
 0x1d7   :  { %v3857_v53 = vpop.f32.mrb[126].mxu1  ;;  %9623 = vmatpush3.bf16.msra.mxu1 %v9946_v61  ;;  %v9187_v55 = vpop.f32.mrb[127].mxu0  ;;  %9628 = vmatprep.subr.bf16.mxu0 %v9991_v1  ;;  %v3982_v7 = vpack.c.bf16 %v3918_v37, %v3918_v37 }
 0x1d8   :  { %v9195_v11 = vpop.f32.mrb[127].mxu1  ;;  %9636 = vmatprep.subr.bf16.mxu1 %v9991_v1  ;;  %v9960_v55 = vld [vmem:[%s11892_s2 + $0x3d0] sm:$0xff]  }
 0x1d9   :  { %9617 = vmatmul.mubr.msk.bf16.vlgmr.msra.gmra.mrb[232].mxu0 %vm351_vm1, %v3976_v50 }
 0x1da   :  { %9625 = vmatmul.mubr.msk.bf16.vlgmr.msra.gmra.mrb[232].mxu1 %vm351_vm1, %v3977_v59  ;;  %9629 = vmatpush3.bf16.msra.mxu0 %v9947_v26 }
 0x1db   :  { %9637 = vmatpush3.bf16.msra.mxu1 %v9948_v54  ;;  %9630 = vmatprep.subr.bf16.mxu0 %v9991_v1  ;;  %v3983_v54 = vpack.c.bf16 %v3919_v58, %v3919_v58 }
 0x1dc   :  { %v4293_v38 = vpop.f32.mrb[128].mxu0  ;;  %9638 = vmatprep.subr.bf16.mxu1 %v9991_v1  ;;  %9632 = vmatprep.mubr.msk.bf16.mxu0 %vm9992_vm0, %v9991_v1 }
 0x1dd   :  { %v7765_v63 = vsel %vm7764_vm2, %v4293_v38, 0.0  ;;  %v4348_v2 = vpop.f32.mrb[128].mxu1  ;;  %v9202_v21 = vpop.f32.mrb[129].mxu0  ;;  %9640 = vmatprep.mubr.msk.bf16.mxu1 %vm9992_vm0, %v9991_v1 }
 0x1de   :  { %v7766_v17 = vsel %vm7764_vm2, %v4348_v2, 0.0  ;;  %v9210_v3 = vpop.f32.mrb[129].mxu1  ;;  %v4296_v8 = vpop.f32.mrb[130].mxu0  ;;  %9631 = vmatpush3.bf16.msra.mxu0 %v9949_v34  ;;  %v9961_v34 = vld [vmem:[%s11892_s2 + $0x3c8] sm:$0xff]  }
 0x1df   :  { %v7767_v9 = vadd.f32 %v7766_v17, %v7765_v63  ;;  %v4351_v12 = vpop.f32.mrb[130].mxu1  ;;  %9639 = vmatpush3.bf16.msra.mxu1 %v9950_v14  ;;  %v9203_v27 = vpop.f32.mrb[131].mxu0  ;;  %9644 = vmatprep.subr.bf16.mxu0 %v9991_v1  ;;  %v9962_v14 = vld [vmem:[%s11892_s2 + $0x3d8] sm:$0xff]   ;;  %v3984_v8 = vpack.c.bf16 %v3920_v62, %v3920_v62 }
 0x1e0   :  { %v9211_v30 = vpop.f32.mrb[131].mxu1  ;;  %9652 = vmatprep.subr.bf16.mxu1 %v9991_v1  ;;  %v9964_v12 = vld [vmem:[%s11892_s2 + $0x3f0] sm:$0xff]   ;;  %v3985_v27 = vpack.c.bf16 %v3921_v39, %v3921_v39 }
 0x1e1   :  { %9633 = vmatmul.mubr.msk.bf16.vlgmr.msra.gmra.mrb[236].mxu0 %vm351_vm1, %v3978_v24  ;;  %v9965_v30 = vld [vmem:[%s11892_s2 + $0x3e8] sm:$0xff]  }
 0x1e2   :  { %9641 = vmatmul.mubr.msk.bf16.vlgmr.msra.gmra.mrb[236].mxu1 %vm351_vm1, %v3979_v15  ;;  %9645 = vmatpush3.bf16.msra.mxu0 %v9951_v44 }
 0x1e3   :  { %9653 = vmatpush3.bf16.msra.mxu1 %v9952_v52  ;;  %9646 = vmatprep.subr.bf16.mxu0 %v9991_v1 }
 0x1e4   :  { %v4403_v35 = vpop.f32.mrb[132].mxu0  ;;  %9654 = vmatprep.subr.bf16.mxu1 %v9991_v1  ;;  %9648 = vmatprep.mubr.msk.bf16.mxu0 %vm9992_vm0, %v9991_v1 }
 0x1e5   :  { %v7768_v19 = vsel %vm7764_vm2, %v4403_v35, 0.0  ;;  %v4458_v25 = vpop.f32.mrb[132].mxu1  ;;  %v9218_v40 = vpop.f32.mrb[133].mxu0  ;;  %9656 = vmatprep.mubr.msk.bf16.mxu1 %vm9992_vm0, %v9991_v1 }
 0x1e6   :  { %v7769_v33 = vadd.f32 %v7768_v19, %v7767_v9  ;;  %v9226_v6 = vpop.f32.mrb[133].mxu1  ;;  %v4406_v28 = vpop.f32.mrb[134].mxu0  ;;  %9647 = vmatpush3.bf16.msra.mxu0 %v9953_v42  ;;  %v7770_v5 = vsel %vm7764_vm2, %v4458_v25, 0.0  ;;  %v3922_v42 = vmax.f32 %v11680_v22, 0.0 }
 0x1e7   :  { %v4461_v31 = vpop.f32.mrb[134].mxu1  ;;  %9655 = vmatpush3.bf16.msra.mxu1 %v9954_v16  ;;  %v9219_v48 = vpop.f32.mrb[135].mxu0  ;;  %9660 = vmatprep.subr.bf16.mxu0 %v9991_v1  ;;  %v3923_v16 = vmax.f32 %v11685_v47, 0.0 }
 0x1e8   :  { %v7771_v32 = vadd.f32 %v7770_v5, %v7769_v33  ;;  %v9227_v36 = vpop.f32.mrb[135].mxu1  ;;  %9668 = vmatprep.subr.bf16.mxu1 %v9991_v1  ;;  %v3986_v6 = vpack.c.bf16 %v3922_v42, %v3922_v42 }
 0x1e9   :  { %9649 = vmatmul.mubr.msk.bf16.vlgmr.msra.gmra.mrb[240].mxu0 %vm351_vm1, %v3980_v45  ;;  %v3987_v45 = vpack.c.bf16 %v3923_v16, %v3923_v16 }
 0x1ea   :  { %9657 = vmatmul.mubr.msk.bf16.vlgmr.msra.gmra.mrb[240].mxu1 %vm351_vm1, %v3981_v10  ;;  %9661 = vmatpush3.bf16.msra.mxu0 %v9955_v60 }
 0x1eb   :  { %9669 = vmatpush3.bf16.msra.mxu1 %v9956_v56  ;;  %9662 = vmatprep.subr.bf16.mxu0 %v9991_v1 }
 0x1ec   :  { %v4513_v20 = vpop.f32.mrb[136].mxu0  ;;  %9670 = vmatprep.subr.bf16.mxu1 %v9991_v1  ;;  %9664 = vmatprep.mubr.msk.bf16.mxu0 %vm9992_vm0, %v9991_v1 }
 0x1ed   :  { %v7772_v46 = vsel %vm7764_vm2, %v4513_v20, 0.0  ;;  %v4568_v61 = vpop.f32.mrb[136].mxu1  ;;  %v9234_v23 = vpop.f32.mrb[137].mxu0  ;;  %9672 = vmatprep.mubr.msk.bf16.mxu1 %vm9992_vm0, %v9991_v1 }
 0x1ee   :  { %v7773_v51 = vadd.f32 %v7772_v46, %v7771_v32  ;;  %v9242_v49 = vpop.f32.mrb[137].mxu1  ;;  %v4516_v0 = vpop.f32.mrb[138].mxu0  ;;  %9663 = vmatpush3.bf16.msra.mxu0 %v9957_v41  ;;  %v7774_v26 = vsel %vm7764_vm2, %v4568_v61, 0.0 }
 0x1ef   :  { %v4571_v50 = vpop.f32.mrb[138].mxu1  ;;  %9671 = vmatpush3.bf16.msra.mxu1 %v9958_v43  ;;  %v9235_v53 = vpop.f32.mrb[139].mxu0  ;;  %9676 = vmatprep.subr.bf16.mxu0 %v9991_v1 }
 0x1f0   :  { %v7775_v59 = vadd.f32 %v7774_v26, %v7773_v51  ;;  %v9243_v11 = vpop.f32.mrb[139].mxu1  ;;  %9684 = vmatprep.subr.bf16.mxu1 %v9991_v1 }
 0x1f1   :  { %9665 = vmatmul.mubr.msk.bf16.vlgmr.msra.gmra.mrb[244].mxu0 %vm351_vm1, %v3982_v7 }
 0x1f2   :  { %9673 = vmatmul.mubr.msk.bf16.vlgmr.msra.gmra.mrb[244].mxu1 %vm351_vm1, %v3983_v54  ;;  %9677 = vmatpush3.bf16.msra.mxu0 %v9959_v13 }
 0x1f3   :  { %9685 = vmatpush3.bf16.msra.mxu1 %v9960_v55  ;;  %9678 = vmatprep.subr.bf16.mxu0 %v9991_v1 }
 0x1f4   :  { %v4623_v38 = vpop.f32.mrb[140].mxu0  ;;  %9686 = vmatprep.subr.bf16.mxu1 %v9991_v1  ;;  %9680 = vmatprep.mubr.msk.bf16.mxu0 %vm9992_vm0, %v9991_v1 }
 0x1f5   :  { %v7776_v63 = vsel %vm7764_vm2, %v4623_v38, 0.0  ;;  %v4678_v2 = vpop.f32.mrb[140].mxu1  ;;  %v9250_v21 = vpop.f32.mrb[141].mxu0  ;;  %9688 = vmatprep.mubr.msk.bf16.mxu1 %vm9992_vm0, %v9991_v1 }
 0x1f6   :  { %v7777_v4 = vadd.f32 %v7776_v63, %v7775_v59  ;;  %v9258_v17 = vpop.f32.mrb[141].mxu1  ;;  %v4626_v3 = vpop.f32.mrb[142].mxu0  ;;  %9679 = vmatpush3.bf16.msra.mxu0 %v9961_v34  ;;  %v7778_v44 = vsel %vm7764_vm2, %v4678_v2, 0.0 }
 0x1f7   :  { %v4681_v24 = vpop.f32.mrb[142].mxu1  ;;  %9687 = vmatpush3.bf16.msra.mxu1 %v9962_v14  ;;  %v9251_v9 = vpop.f32.mrb[143].mxu0  ;;  %9692 = vmatprep.subr.bf16.mxu0 %v9991_v1 }
 0x1f8   :  { %v7779_v52 = vadd.f32 %v7778_v44, %v7777_v4  ;;  %v9259_v15 = vpop.f32.mrb[143].mxu1  ;;  %9700 = vmatprep.subr.bf16.mxu1 %v9991_v1 }
 0x1f9   :  { %9681 = vmatmul.mubr.msk.bf16.vlgmr.msra.gmra.mrb[248].mxu0 %vm351_vm1, %v3984_v8 }
 0x1fa   :  { %9689 = vmatmul.mubr.msk.bf16.vlgmr.msra.gmra.mrb[248].mxu1 %vm351_vm1, %v3985_v27  ;;  %9693 = vmatpush3.bf16.msra.mxu0 %v9963_v29 }
 0x1fb   :  { %9701 = vmatpush3.bf16.msra.mxu1 %v9964_v12  ;;  %9694 = vmatprep.subr.bf16.mxu0 %v9991_v1 }
 0x1fc   :  { %v4733_v18 = vpop.f32.mrb[144].mxu0  ;;  %9702 = vmatprep.subr.bf16.mxu1 %v9991_v1  ;;  %9696 = vmatprep.mubr.msk.bf16.mxu0 %vm9992_vm0, %v9991_v1 }
 0x1fd   :  { %v7780_v35 = vsel %vm7764_vm2, %v4733_v18, 0.0  ;;  %v4788_v19 = vpop.f32.mrb[144].mxu1  ;;  %v9266_v25 = vpop.f32.mrb[145].mxu0  ;;  %9704 = vmatprep.mubr.msk.bf16.mxu1 %vm9992_vm0, %v9991_v1 }
 0x1fe   :  { %v7781_v22 = vadd.f32 %v7780_v35, %v7779_v52  ;;  %v9274_v40 = vpop.f32.mrb[145].mxu1  ;;  %v4736_v33 = vpop.f32.mrb[146].mxu0  ;;  %9695 = vmatpush3.bf16.msra.mxu0 %v9965_v30  ;;  %v7782_v47 = vsel %vm7764_vm2, %v4788_v19, 0.0 }
 0x1ff   :  { %v4791_v28 = vpop.f32.mrb[146].mxu1  ;;  %9703 = vmatpush3.bf16.msra.mxu1 %v9966_v57  ;;  %v9267_v60 = vpop.f32.mrb[147].mxu0 }
 0x200   :  { %v7783_v5 = vadd.f32 %v7782_v47, %v7781_v22  ;;  %v9275_v31 = vpop.f32.mrb[147].mxu1 }
 0x201   :  { %9697 = vmatmul.mubr.msk.bf16.vlgmr.msra.gmra.mrb[252].mxu0 %vm351_vm1, %v3986_v6 }
 0x202   :  { %9705 = vmatmul.mubr.msk.bf16.vlgmr.msra.gmra.mrb[252].mxu1 %vm351_vm1, %v3987_v45 }
 0x204   :  { %v4843_v48 = vpop.f32.mrb[148].mxu0 }
 0x205   :  { %v7784_v1 = vsel %vm7764_vm2, %v4843_v48, 0.0  ;;  %v4898_v56 = vpop.f32.mrb[148].mxu1  ;;  %v9282_v10 = vpop.f32.mrb[149].mxu0 }
 0x206   :  { %v7785_v32 = vadd.f32 %v7784_v1, %v7783_v5  ;;  %v9290_v36 = vpop.f32.mrb[149].mxu1  ;;  %v4846_v41 = vpop.f32.mrb[150].mxu0  ;;  %v7786_v37 = vsel %vm7764_vm2, %v4898_v56, 0.0 }
 0x207   :  { %v4901_v43 = vpop.f32.mrb[150].mxu1  ;;  %v9283_v58 = vpop.f32.mrb[151].mxu0 }
 0x208   :  { %v7787_v20 = vadd.f32 %v7786_v37, %v7785_v32  ;;  %v9291_v46 = vpop.f32.mrb[151].mxu1 }
 0x20c   :  { %v4953_v61 = vpop.f32.mrb[152].mxu0 }
 0x20d   :  { %v7788_v23 = vsel %vm7764_vm2, %v4953_v61, 0.0  ;;  %v5008_v51 = vpop.f32.mrb[152].mxu1  ;;  %v9298_v49 = vpop.f32.mrb[153].mxu0 }
 0x20e   :  { %v7789_v0 = vadd.f32 %v7788_v23, %v7787_v20  ;;  %v9306_v13 = vpop.f32.mrb[153].mxu1  ;;  %v4956_v7 = vpop.f32.mrb[154].mxu0  ;;  %v7790_v26 = vsel %vm7764_vm2, %v5008_v51, 0.0 }
 0x20f   :  { %v5011_v50 = vpop.f32.mrb[154].mxu1  ;;  %v9299_v53 = vpop.f32.mrb[155].mxu0 }
 0x210   :  { %v7791_v55 = vadd.f32 %v7790_v26, %v7789_v0  ;;  %v9307_v54 = vpop.f32.mrb[155].mxu1 }
 0x214   :  { %v5063_v59 = vpop.f32.mrb[156].mxu0 }
 0x215   :  { %v7792_v11 = vsel %vm7764_vm2, %v5063_v59, 0.0  ;;  %v5118_v34 = vpop.f32.mrb[156].mxu1  ;;  %v9314_v62 = vpop.f32.mrb[157].mxu0 }
 0x216   :  { %v7793_v14 = vadd.f32 %v7792_v11, %v7791_v55  ;;  %v9322_v39 = vpop.f32.mrb[157].mxu1  ;;  %v5066_v38 = vpop.f32.mrb[158].mxu0  ;;  %v7794_v63 = vsel %vm7764_vm2, %v5118_v34, 0.0 }
 0x217   :  { %v5121_v2 = vpop.f32.mrb[158].mxu1  ;;  %v9315_v21 = vpop.f32.mrb[159].mxu0 }
 0x218   :  { %v7795_v4 = vadd.f32 %v7794_v63, %v7793_v14  ;;  %v9323_v17 = vpop.f32.mrb[159].mxu1 }
 0x21c   :  { %v5173_v3 = vpop.f32.mrb[160].mxu0 }
 0x21d   :  { %v7796_v29 = vsel %vm7764_vm2, %v5173_v3, 0.0  ;;  %v5228_v8 = vpop.f32.mrb[160].mxu1  ;;  %v9330_v44 = vpop.f32.mrb[161].mxu0 }
 0x21e   :  { %v7797_v24 = vadd.f32 %v7796_v29, %v7795_v4  ;;  %v9338_v9 = vpop.f32.mrb[161].mxu1  ;;  %v5176_v12 = vpop.f32.mrb[162].mxu0  ;;  %v7798_v27 = vsel %vm7764_vm2, %v5228_v8, 0.0 }
 0x21f   :  { %v5231_v52 = vpop.f32.mrb[162].mxu1  ;;  %v9331_v15 = vpop.f32.mrb[163].mxu0 }
 0x220   :  { %v7799_v30 = vadd.f32 %v7798_v27, %v7797_v24  ;;  %v9339_v42 = vpop.f32.mrb[163].mxu1 }
 0x224   :  { %v5283_v57 = vpop.f32.mrb[164].mxu0 }
 0x225   :  { %v7800_v16 = vsel %vm7764_vm2, %v5283_v57, 0.0  ;;  %v5338_v18 = vpop.f32.mrb[164].mxu1  ;;  %v9346_v35 = vpop.f32.mrb[165].mxu0 }
 0x226   :  { %v7801_v19 = vadd.f32 %v7800_v16, %v7799_v30  ;;  %v9354_v25 = vpop.f32.mrb[165].mxu1  ;;  %v5286_v22 = vpop.f32.mrb[166].mxu0  ;;  %v7802_v40 = vsel %vm7764_vm2, %v5338_v18, 0.0 }
 0x227   :  { %v5341_v33 = vpop.f32.mrb[166].mxu1  ;;  %v9347_v6 = vpop.f32.mrb[167].mxu0 }
 0x228   :  { %v7803_v47 = vadd.f32 %v7802_v40, %v7801_v19  ;;  %v9355_v28 = vpop.f32.mrb[167].mxu1 }
 0x22c   :  { %v5393_v60 = vpop.f32.mrb[168].mxu0 }
 0x22d   :  { %v7804_v45 = vsel %vm7764_vm2, %v5393_v60, 0.0  ;;  %v5448_v5 = vpop.f32.mrb[168].mxu1  ;;  %v9362_v31 = vpop.f32.mrb[169].mxu0 }
 0x22e   :  { %v7805_v48 = vadd.f32 %v7804_v45, %v7803_v47  ;;  %v9370_v1 = vpop.f32.mrb[169].mxu1  ;;  %v5396_v56 = vpop.f32.mrb[170].mxu0  ;;  %v7806_v10 = vsel %vm7764_vm2, %v5448_v5, 0.0 }
 0x22f   :  { %v5451_v32 = vpop.f32.mrb[170].mxu1  ;;  %v9363_v36 = vpop.f32.mrb[171].mxu0 }
 0x230   :  { %v7807_v41 = vadd.f32 %v7806_v10, %v7805_v48  ;;  %v9371_v37 = vpop.f32.mrb[171].mxu1 }
 0x234   :  { %v5503_v43 = vpop.f32.mrb[172].mxu0 }
 0x235   :  { %v7808_v58 = vsel %vm7764_vm2, %v5503_v43, 0.0  ;;  %v5558_v20 = vpop.f32.mrb[172].mxu1  ;;  %v9378_v46 = vpop.f32.mrb[173].mxu0 }
 0x236   :  { %v7809_v61 = vadd.f32 %v7808_v58, %v7807_v41  ;;  %v9386_v23 = vpop.f32.mrb[173].mxu1  ;;  %v5506_v51 = vpop.f32.mrb[174].mxu0  ;;  %v7810_v49 = vsel %vm7764_vm2, %v5558_v20, 0.0 }
 0x237   :  { %v5561_v0 = vpop.f32.mrb[174].mxu1  ;;  %v9379_v13 = vpop.f32.mrb[175].mxu0 }
 0x238   :  { %v7811_v7 = vadd.f32 %v7810_v49, %v7809_v61  ;;  %v9387_v26 = vpop.f32.mrb[175].mxu1 }
 0x23c   :  { %v5613_v50 = vpop.f32.mrb[176].mxu0 }
 0x23d   :  { %v7812_v53 = vsel %vm7764_vm2, %v5613_v50, 0.0  ;;  %v5668_v55 = vpop.f32.mrb[176].mxu1  ;;  %v9394_v54 = vpop.f32.mrb[177].mxu0 }
 0x23e   :  { %v7813_v59 = vadd.f32 %v7812_v53, %v7811_v7  ;;  %v9402_v11 = vpop.f32.mrb[177].mxu1  ;;  %v5616_v34 = vpop.f32.mrb[178].mxu0  ;;  %v7814_v62 = vsel %vm7764_vm2, %v5668_v55, 0.0 }
 0x23f   :  { %v5671_v14 = vpop.f32.mrb[178].mxu1  ;;  %v9395_v39 = vpop.f32.mrb[179].mxu0 }
 0x240   :  { %v7815_v38 = vadd.f32 %v7814_v62, %v7813_v59  ;;  %v9403_v63 = vpop.f32.mrb[179].mxu1 }
 0x244   :  { %v5723_v2 = vpop.f32.mrb[180].mxu0 }
 0x245   :  { %v7816_v21 = vsel %vm7764_vm2, %v5723_v2, 0.0  ;;  %v5778_v4 = vpop.f32.mrb[180].mxu1  ;;  %v9410_v17 = vpop.f32.mrb[181].mxu0 }
 0x246   :  { %v7817_v3 = vadd.f32 %v7816_v21, %v7815_v38  ;;  %v9418_v29 = vpop.f32.mrb[181].mxu1  ;;  %v5726_v8 = vpop.f32.mrb[182].mxu0  ;;  %v7818_v44 = vsel %vm7764_vm2, %v5778_v4, 0.0 }
 0x247   :  { %v5781_v24 = vpop.f32.mrb[182].mxu1  ;;  %v9411_v9 = vpop.f32.mrb[183].mxu0 }
 0x248   :  { %v7819_v12 = vadd.f32 %v7818_v44, %v7817_v3  ;;  %v9419_v27 = vpop.f32.mrb[183].mxu1 }
 0x24c   :  { %v5833_v52 = vpop.f32.mrb[184].mxu0 }
 0x24d   :  { %v7820_v15 = vsel %vm7764_vm2, %v5833_v52, 0.0  ;;  %v5888_v30 = vpop.f32.mrb[184].mxu1  ;;  %v9426_v42 = vpop.f32.mrb[185].mxu0 }
 0x24e   :  { %v7821_v57 = vadd.f32 %v7820_v15, %v7819_v12  ;;  %v9434_v16 = vpop.f32.mrb[185].mxu1  ;;  %v5836_v18 = vpop.f32.mrb[186].mxu0  ;;  %v7822_v35 = vsel %vm7764_vm2, %v5888_v30, 0.0 }
 0x24f   :  { %v5891_v19 = vpop.f32.mrb[186].mxu1  ;;  %v9427_v25 = vpop.f32.mrb[187].mxu0 }
 0x250   :  { %v7823_v22 = vadd.f32 %v7822_v35, %v7821_v57  ;;  %v9435_v40 = vpop.f32.mrb[187].mxu1 }
 0x254   :  { %v5943_v33 = vpop.f32.mrb[188].mxu0 }
 0x255   :  { %v7824_v6 = vsel %vm7764_vm2, %v5943_v33, 0.0  ;;  %v5998_v47 = vpop.f32.mrb[188].mxu1  ;;  %v9442_v28 = vpop.f32.mrb[189].mxu0 }
 0x256   :  { %v7825_v60 = vadd.f32 %v7824_v6, %v7823_v22  ;;  %v9450_v45 = vpop.f32.mrb[189].mxu1  ;;  %v5946_v5 = vpop.f32.mrb[190].mxu0  ;;  %v7826_v31 = vsel %vm7764_vm2, %v5998_v47, 0.0 }
 0x257   :  { %v6001_v48 = vpop.f32.mrb[190].mxu1  ;;  %v9443_v1 = vpop.f32.mrb[191].mxu0 }
 0x258   :  { %v7827_v56 = vadd.f32 %v7826_v31, %v7825_v60  ;;  %v9451_v10 = vpop.f32.mrb[191].mxu1 }
 0x25c   :  { %v6053_v32 = vpop.f32.mrb[192].mxu0 }
 0x25d   :  { %v7828_v36 = vsel %vm7764_vm2, %v6053_v32, 0.0  ;;  %v6108_v41 = vpop.f32.mrb[192].mxu1  ;;  %v9458_v37 = vpop.f32.mrb[193].mxu0 }
 0x25e   :  { %v7829_v43 = vadd.f32 %v7828_v36, %v7827_v56  ;;  %v9466_v58 = vpop.f32.mrb[193].mxu1  ;;  %v6056_v20 = vpop.f32.mrb[194].mxu0  ;;  %v7830_v46 = vsel %vm7764_vm2, %v6108_v41, 0.0 }
 0x25f   :  { %v6111_v61 = vpop.f32.mrb[194].mxu1  ;;  %v9459_v23 = vpop.f32.mrb[195].mxu0 }
 0x260   :  { %v7831_v51 = vadd.f32 %v7830_v46, %v7829_v43  ;;  %v9467_v49 = vpop.f32.mrb[195].mxu1 }
 0x264   :  { %v6163_v0 = vpop.f32.mrb[196].mxu0 }
 0x265   :  { %v7832_v13 = vsel %vm7764_vm2, %v6163_v0, 0.0  ;;  %v6218_v7 = vpop.f32.mrb[196].mxu1  ;;  %v9474_v26 = vpop.f32.mrb[197].mxu0 }
 0x266   :  { %v7833_v50 = vadd.f32 %v7832_v13, %v7831_v51  ;;  %v9482_v53 = vpop.f32.mrb[197].mxu1  ;;  %v6166_v55 = vpop.f32.mrb[198].mxu0  ;;  %v7834_v54 = vsel %vm7764_vm2, %v6218_v7, 0.0 }
 0x267   :  { %v6221_v59 = vpop.f32.mrb[198].mxu1  ;;  %v9475_v11 = vpop.f32.mrb[199].mxu0 }
 0x268   :  { %v7835_v34 = vadd.f32 %v7834_v54, %v7833_v50  ;;  %v9483_v62 = vpop.f32.mrb[199].mxu1 }
 0x26c   :  { %v6273_v14 = vpop.f32.mrb[200].mxu0 }
 0x26d   :  { %v7836_v39 = vsel %vm7764_vm2, %v6273_v14, 0.0  ;;  %v6328_v38 = vpop.f32.mrb[200].mxu1  ;;  %v9490_v63 = vpop.f32.mrb[201].mxu0 }
 0x26e   :  { %v7837_v2 = vadd.f32 %v7836_v39, %v7835_v34  ;;  %v9498_v21 = vpop.f32.mrb[201].mxu1  ;;  %v6276_v4 = vpop.f32.mrb[202].mxu0  ;;  %v7838_v17 = vsel %vm7764_vm2, %v6328_v38, 0.0 }
 0x26f   :  { %v6331_v3 = vpop.f32.mrb[202].mxu1  ;;  %v9491_v29 = vpop.f32.mrb[203].mxu0 }
 0x270   :  { %v7839_v8 = vadd.f32 %v7838_v17, %v7837_v2  ;;  %v9499_v44 = vpop.f32.mrb[203].mxu1 }
 0x274   :  { %v6383_v24 = vpop.f32.mrb[204].mxu0 }
 0x275   :  { %v7840_v9 = vsel %vm7764_vm2, %v6383_v24, 0.0  ;;  %v6438_v12 = vpop.f32.mrb[204].mxu1  ;;  %v9506_v27 = vpop.f32.mrb[205].mxu0 }
 0x276   :  { %v7841_v52 = vadd.f32 %v7840_v9, %v7839_v8  ;;  %v9514_v15 = vpop.f32.mrb[205].mxu1  ;;  %v6386_v30 = vpop.f32.mrb[206].mxu0  ;;  %v7842_v42 = vsel %vm7764_vm2, %v6438_v12, 0.0 }
 0x277   :  { %v6441_v57 = vpop.f32.mrb[206].mxu1  ;;  %v9507_v16 = vpop.f32.mrb[207].mxu0 }
 0x278   :  { %v7843_v18 = vadd.f32 %v7842_v42, %v7841_v52  ;;  %v9515_v35 = vpop.f32.mrb[207].mxu1 }
 0x27c   :  { %v6493_v19 = vpop.f32.mrb[208].mxu0 }
 0x27d   :  { %v7844_v25 = vsel %vm7764_vm2, %v6493_v19, 0.0  ;;  %v6548_v22 = vpop.f32.mrb[208].mxu1  ;;  %v9522_v40 = vpop.f32.mrb[209].mxu0 }
 0x27e   :  { %v7845_v33 = vadd.f32 %v7844_v25, %v7843_v18  ;;  %v9530_v6 = vpop.f32.mrb[209].mxu1  ;;  %v6496_v47 = vpop.f32.mrb[210].mxu0  ;;  %v7846_v28 = vsel %vm7764_vm2, %v6548_v22, 0.0 }
 0x27f   :  { %v6551_v60 = vpop.f32.mrb[210].mxu1  ;;  %v9523_v45 = vpop.f32.mrb[211].mxu0 }
 0x280   :  { %v7847_v5 = vadd.f32 %v7846_v28, %v7845_v33  ;;  %v9531_v31 = vpop.f32.mrb[211].mxu1 }
 0x284   :  { %v6603_v48 = vpop.f32.mrb[212].mxu0 }
 0x285   :  { %v7848_v1 = vsel %vm7764_vm2, %v6603_v48, 0.0  ;;  %v6658_v56 = vpop.f32.mrb[212].mxu1  ;;  %v9538_v10 = vpop.f32.mrb[213].mxu0 }
 0x286   :  { %v7849_v32 = vadd.f32 %v7848_v1, %v7847_v5  ;;  %v9546_v36 = vpop.f32.mrb[213].mxu1  ;;  %v6606_v41 = vpop.f32.mrb[214].mxu0  ;;  %v7850_v37 = vsel %vm7764_vm2, %v6658_v56, 0.0 }
 0x287   :  { %v6661_v43 = vpop.f32.mrb[214].mxu1  ;;  %v9539_v58 = vpop.f32.mrb[215].mxu0 }
 0x288   :  { %v7851_v20 = vadd.f32 %v7850_v37, %v7849_v32  ;;  %v9547_v46 = vpop.f32.mrb[215].mxu1 }
 0x28c   :  { %v6713_v61 = vpop.f32.mrb[216].mxu0 }
 0x28d   :  { %v7852_v23 = vsel %vm7764_vm2, %v6713_v61, 0.0  ;;  %v6768_v51 = vpop.f32.mrb[216].mxu1  ;;  %v9554_v49 = vpop.f32.mrb[217].mxu0 }
 0x28e   :  { %v7853_v0 = vadd.f32 %v7852_v23, %v7851_v20  ;;  %v9562_v13 = vpop.f32.mrb[217].mxu1  ;;  %v6716_v7 = vpop.f32.mrb[218].mxu0  ;;  %v7854_v26 = vsel %vm7764_vm2, %v6768_v51, 0.0 }
 0x28f   :  { %v6771_v50 = vpop.f32.mrb[218].mxu1  ;;  %v9555_v53 = vpop.f32.mrb[219].mxu0 }
 0x290   :  { %v7855_v55 = vadd.f32 %v7854_v26, %v7853_v0  ;;  %v9563_v54 = vpop.f32.mrb[219].mxu1 }
 0x294   :  { %v6823_v59 = vpop.f32.mrb[220].mxu0 }
 0x295   :  { %v7856_v11 = vsel %vm7764_vm2, %v6823_v59, 0.0  ;;  %v6878_v34 = vpop.f32.mrb[220].mxu1  ;;  %v9570_v62 = vpop.f32.mrb[221].mxu0 }
 0x296   :  { %v7857_v14 = vadd.f32 %v7856_v11, %v7855_v55  ;;  %v9578_v39 = vpop.f32.mrb[221].mxu1  ;;  %v6826_v38 = vpop.f32.mrb[222].mxu0  ;;  %v7858_v63 = vsel %vm7764_vm2, %v6878_v34, 0.0 }
 0x297   :  { %v6881_v2 = vpop.f32.mrb[222].mxu1  ;;  %v9571_v21 = vpop.f32.mrb[223].mxu0 }
 0x298   :  { %v7859_v4 = vadd.f32 %v7858_v63, %v7857_v14  ;;  %v9579_v17 = vpop.f32.mrb[223].mxu1 }
 0x29c   :  { %v6933_v3 = vpop.f32.mrb[224].mxu0 }
 0x29d   :  { %v7860_v29 = vsel %vm7764_vm2, %v6933_v3, 0.0  ;;  %v6988_v8 = vpop.f32.mrb[224].mxu1  ;;  %v9586_v44 = vpop.f32.mrb[225].mxu0 }
 0x29e   :  { %v7861_v24 = vadd.f32 %v7860_v29, %v7859_v4  ;;  %v9594_v9 = vpop.f32.mrb[225].mxu1  ;;  %v6936_v12 = vpop.f32.mrb[226].mxu0  ;;  %v7862_v27 = vsel %vm7764_vm2, %v6988_v8, 0.0 }
 0x29f   :  { %v6991_v52 = vpop.f32.mrb[226].mxu1  ;;  %v9587_v15 = vpop.f32.mrb[227].mxu0 }
 0x2a0   :  { %v7863_v30 = vadd.f32 %v7862_v27, %v7861_v24  ;;  %v9595_v42 = vpop.f32.mrb[227].mxu1 }
 0x2a4   :  { %v7043_v57 = vpop.f32.mrb[228].mxu0 }
 0x2a5   :  { %v7864_v16 = vsel %vm7764_vm2, %v7043_v57, 0.0  ;;  %v7098_v18 = vpop.f32.mrb[228].mxu1  ;;  %v9602_v35 = vpop.f32.mrb[229].mxu0 }
 0x2a6   :  { %v7865_v19 = vadd.f32 %v7864_v16, %v7863_v30  ;;  %v9610_v25 = vpop.f32.mrb[229].mxu1  ;;  %v7046_v22 = vpop.f32.mrb[230].mxu0  ;;  %v7866_v40 = vsel %vm7764_vm2, %v7098_v18, 0.0 }
 0x2a7   :  { %v7101_v33 = vpop.f32.mrb[230].mxu1  ;;  %v9603_v6 = vpop.f32.mrb[231].mxu0 }
 0x2a8   :  { %v7867_v47 = vadd.f32 %v7866_v40, %v7865_v19  ;;  %v9611_v28 = vpop.f32.mrb[231].mxu1 }
 0x2ac   :  { %v7153_v60 = vpop.f32.mrb[232].mxu0 }
 0x2ad   :  { %v7868_v45 = vsel %vm7764_vm2, %v7153_v60, 0.0  ;;  %v7208_v5 = vpop.f32.mrb[232].mxu1  ;;  %v9618_v31 = vpop.f32.mrb[233].mxu0 }
 0x2ae   :  { %v7869_v48 = vadd.f32 %v7868_v45, %v7867_v47  ;;  %v9626_v1 = vpop.f32.mrb[233].mxu1  ;;  %v7156_v56 = vpop.f32.mrb[234].mxu0  ;;  %v7870_v10 = vsel %vm7764_vm2, %v7208_v5, 0.0 }
 0x2af   :  { %v7211_v32 = vpop.f32.mrb[234].mxu1  ;;  %v9619_v36 = vpop.f32.mrb[235].mxu0  ;;  %v8299_v56 = vld [vmem:[%s11893_s3] ss:$0 sm:$0xff] }
 0x2b0   :  { %v7871_v41 = vadd.f32 %v7870_v10, %v7869_v48  ;;  %v9627_v37 = vpop.f32.mrb[235].mxu1 }
 0x2b4   :  { %v7263_v43 = vpop.f32.mrb[236].mxu0 }
 0x2b5   :  { %v7872_v58 = vsel %vm7764_vm2, %v7263_v43, 0.0  ;;  %v7318_v20 = vpop.f32.mrb[236].mxu1  ;;  %v9634_v46 = vpop.f32.mrb[237].mxu0 }
 0x2b6   :  { %v7873_v61 = vadd.f32 %v7872_v58, %v7871_v41  ;;  %v9642_v23 = vpop.f32.mrb[237].mxu1  ;;  %v7266_v51 = vpop.f32.mrb[238].mxu0  ;;  %v7874_v49 = vsel %vm7764_vm2, %v7318_v20, 0.0 }
 0x2b7   :  { %v7321_v0 = vpop.f32.mrb[238].mxu1  ;;  %v9635_v13 = vpop.f32.mrb[239].mxu0 }
 0x2b8   :  { %v7875_v7 = vadd.f32 %v7874_v49, %v7873_v61  ;;  %v9643_v26 = vpop.f32.mrb[239].mxu1 }
 0x2bc   :  { %v7373_v50 = vpop.f32.mrb[240].mxu0 }
 0x2bd   :  { %v7876_v53 = vsel %vm7764_vm2, %v7373_v50, 0.0  ;;  %v7428_v55 = vpop.f32.mrb[240].mxu1  ;;  %v9650_v54 = vpop.f32.mrb[241].mxu0 }
 0x2be   :  { %v7877_v59 = vadd.f32 %v7876_v53, %v7875_v7  ;;  %v9658_v11 = vpop.f32.mrb[241].mxu1  ;;  %v7376_v34 = vpop.f32.mrb[242].mxu0  ;;  %v7878_v62 = vsel %vm7764_vm2, %v7428_v55, 0.0 }
 0x2bf   :  { %v7431_v14 = vpop.f32.mrb[242].mxu1  ;;  %v9651_v39 = vpop.f32.mrb[243].mxu0 }
 0x2c0   :  { %v7879_v38 = vadd.f32 %v7878_v62, %v7877_v59  ;;  %v9659_v63 = vpop.f32.mrb[243].mxu1 }
 0x2c4   :  { %v7483_v2 = vpop.f32.mrb[244].mxu0 }
 0x2c5   :  { %v7880_v21 = vsel %vm7764_vm2, %v7483_v2, 0.0  ;;  %v7538_v4 = vpop.f32.mrb[244].mxu1  ;;  %v9666_v17 = vpop.f32.mrb[245].mxu0 }
 0x2c6   :  { %v7881_v3 = vadd.f32 %v7880_v21, %v7879_v38  ;;  %v9674_v29 = vpop.f32.mrb[245].mxu1  ;;  %v7486_v8 = vpop.f32.mrb[246].mxu0  ;;  %v7882_v44 = vsel %vm7764_vm2, %v7538_v4, 0.0 }
 0x2c7   :  { %v7541_v24 = vpop.f32.mrb[246].mxu1  ;;  %v9667_v9 = vpop.f32.mrb[247].mxu0 }
 0x2c8   :  { %v7883_v12 = vadd.f32 %v7882_v44, %v7881_v3  ;;  %v9675_v27 = vpop.f32.mrb[247].mxu1 }
 0x2cc   :  { %v7593_v52 = vpop.f32.mrb[248].mxu0 }
 0x2cd   :  { %v7884_v15 = vsel %vm7764_vm2, %v7593_v52, 0.0  ;;  %v7648_v30 = vpop.f32.mrb[248].mxu1  ;;  %v9682_v42 = vpop.f32.mrb[249].mxu0 }
 0x2ce   :  { %v7885_v57 = vadd.f32 %v7884_v15, %v7883_v12  ;;  %v9690_v16 = vpop.f32.mrb[249].mxu1  ;;  %v7596_v18 = vpop.f32.mrb[250].mxu0  ;;  %v7886_v35 = vsel %vm7764_vm2, %v7648_v30, 0.0 }
 0x2cf   :  { %v7651_v19 = vpop.f32.mrb[250].mxu1  ;;  %v9683_v25 = vpop.f32.mrb[251].mxu0 }
 0x2d0   :  { %v7887_v22 = vadd.f32 %v7886_v35, %v7885_v57  ;;  %v9691_v40 = vpop.f32.mrb[251].mxu1 }
 0x2d4   :  { %v7703_v33 = vpop.f32.mrb[252].mxu0 }
 0x2d5   :  { %v7888_v6 = vsel %vm7764_vm2, %v7703_v33, 0.0  ;;  %v7758_v47 = vpop.f32.mrb[252].mxu1  ;;  %v9698_v28 = vpop.f32.mrb[253].mxu0 }
 0x2d6   :  { %v7889_v60 = vadd.f32 %v7888_v6, %v7887_v22  ;;  %v9706_v45 = vpop.f32.mrb[253].mxu1  ;;  %v7706_v5 = vpop.f32.mrb[254].mxu0  ;;  %v7890_v31 = vsel %vm7764_vm2, %v7758_v47, 0.0 }
 0x2d7   :  { %v7761_v48 = vpop.f32.mrb[254].mxu1  ;;  %v9699_v1 = vpop.f32.mrb[255].mxu0 }
 0x2d8   :  { %v7891_v10 = vadd.f32 %v7890_v31, %v7889_v60  ;;  %v9707_v32 = vpop.f32.mrb[255].mxu1 }
 0x2da   :  { %v7899_v36 = vadd.f32 %v8299_v56, %v7891_v10 }
 0x2dc   :  { %7900 = vst [vmem:[#allocation2] sm:$0x3] %v7899_v36 }
 0x2dd   :  { %9978 = shalt.err (!%p9975_p4)
}
 0x2de   :  { %s9979_s17 = scalar_lea.hbm %s11894_s4, 32 }
 0x2df   :  { %p9980_p5 = scmp.ne.s32.totalorder %s11894_s4, %s9979_s17  ;;  %p9983_p6 = scmp.lt.u32.totalorder %s9979_s17, %s11894_s4 }
 0x2e1   :  { %p9985_p7 = pnand %p9983_p6, %p9980_p5 }
 0x2e3   :  { %9988 = shalt.err (!%p9985_p7)
}
 0x2e4   :  { %7910 = dma.vmem_to_hbm [thread:$0]  %s7908_s13, 32, %s11894_s4, [#allocation3]  }
 0x2e5   :  { %9989 = dma.done.wait [#allocation3], 32  }
 0x2e6   :  { %9990 = vsyncadd [#allocation3], 4294967264 }
 0x2e7   :  { %7914 = vsyncpa [#allocation3], 1 }

</bundles_post_ra>
